<compile_context>
chip_gen: v7x
topology: tpu7x:2x2x1
jax: 0.10.0
libtpu: 0.0.40
codegen_flags: <defaults>
</compile_context>

<pallas_src>
import functools

import jax
import jax.numpy as jnp
import numpy as np
from jax.experimental import pallas as pl
from jax.experimental.pallas import tpu as pltpu


def _capsule_routing_kernel(x_ref, w_ref, out_ref, *, num_iterations,
                            num_route_nodes):
    """One grid step == one block of Cb output capsules.

    x_ref:   (I, B, Rp)      input, route nodes lane-dense (Rp % 128 == 0)
    w_ref:   (I, Cb, D, Rp)  this block's route weights
    out_ref: (Cb, B, D)      squashed capsule outputs
    """
    I, B, Rp = x_ref.shape
    Cb, D = w_ref.shape[1], w_ref.shape[2]

    # priors[c, b, d, r] = sum_i x[i, b, r] * w[i, c, d, r]
    # in_channels is tiny -> unrolled VPU multiply-accumulate over contiguous
    # (sublane, lane) slabs; route nodes stay dense on the lane axis.
    priors = (x_ref[0].astype(jnp.float32)[None, :, None, :]
              * w_ref[0].astype(jnp.float32)[:, None, :, :])
    for i in range(1, I):
        priors = priors + (x_ref[i].astype(jnp.float32)[None, :, None, :]
                           * w_ref[i].astype(jnp.float32)[:, None, :, :])
    # priors: (Cb, B, D, Rp)

    padded = Rp != num_route_nodes
    if padded:  # static: keep lane padding out of softmax / reductions
        valid = (jax.lax.broadcasted_iota(jnp.int32, (1, 1, 1, Rp), 3)
                 < num_route_nodes)

    logits = jnp.zeros((Cb, B, 1, Rp), jnp.float32)
    v = None
    for it in range(num_iterations):
        # Softmax over route nodes (lane-axis reduction), padding masked out of
        # both the max and the sum.
        if padded:
            m = jnp.max(jnp.where(valid, logits, -jnp.inf), axis=-1,
                        keepdims=True)
            e = jnp.where(valid, jnp.exp(logits - m), 0.0)
        else:
            m = jnp.max(logits, axis=-1, keepdims=True)
            e = jnp.exp(logits - m)
        probs = e * pl.reciprocal(jnp.sum(e, axis=-1, keepdims=True),
                                  approx=True)                  # (Cb, B, 1, Rp)

        # Weighted sum over route nodes, then squash over out_channels.
        s = jnp.sum(probs * priors, axis=-1, keepdims=True)     # (Cb, B, D, 1)
        sq = jnp.sum(s * s, axis=2, keepdims=True)              # (Cb, B, 1, 1)
        scale = sq * pl.reciprocal(1.0 + sq, approx=True)
        v = scale * s * jax.lax.rsqrt(jnp.maximum(sq, 1e-30))   # (Cb, B, D, 1)

        if it != num_iterations - 1:
            # delta_logits[c, b, r] = sum_d priors[c, b, d, r] * v[c, b, d]
            logits = logits + jnp.sum(priors * v, axis=2, keepdims=True)

    out_ref[...] = jnp.squeeze(v, axis=-1).astype(out_ref.dtype)   # (Cb, B, D)


def _round_up(n, m):
    return ((n + m - 1) // m) * m


def prepare_route_weights(route_weights, dtype=jnp.float32):
    """One-time relayout of PyTorch-layout (C, R, I, D) route weights into the
    kernel layout (I, C, D, R_pad).

    Call at parameter-init time, OUTSIDE the jitted hot path: the kernel is
    weight-DMA bound, and relaying out per call would roughly triple its HBM
    traffic.  dtype=jnp.bfloat16 halves the dominant weight stream (f32
    accumulation is kept inside the kernel)."""
    C, R, I, D = route_weights.shape
    R_pad = max(128, _round_up(R, 128))
    w = jnp.transpose(route_weights, (2, 0, 3, 1)).astype(dtype)   # (I, C, D, R)
    if R_pad != R:
        w = jnp.pad(w, ((0, 0), (0, 0), (0, 0), (0, R_pad - R)))
    return w


def capsule_layer_forward(x, w_prepared, num_iterations=3):
    """x: (B, R, I) (PyTorch layout); w_prepared: (I, C, D, R_pad) from
    prepare_route_weights.  Returns (C, B, 1, 1, D), matching
    CapsuleLayer.forward (routing branch)."""
    B, R, I = x.shape
    I_w, C, D, R_pad = w_prepared.shape
    assert I_w == I and R_pad % 128 == 0 and R <= R_pad

    # x relayout is tiny (B*R*I elements) and x changes every call, so it can
    # stay inside the jitted hot path: in_channels leading, route nodes
    # lane-dense.
    x_t = jnp.transpose(x, (2, 0, 1)).astype(jnp.float32)          # (I, B, R)
    if R_pad != R:
        x_t = jnp.pad(x_t, ((0, 0), (0, 0), (0, R_pad - R)))

    # Two capsule blocks when possible so the two TensorCores of a v7x chip
    # each take one; on single-TC chips (v5e/v6e) the extra grid step costs
    # one ~0.35 us step overhead -- negligible.
    num_blocks = 2 if (C % 2 == 0 and C >= 2) else 1
    Cb = C // num_blocks

    kernel = functools.partial(_capsule_routing_kernel,
                               num_iterations=num_iterations,
                               num_route_nodes=R)

    flops = (2 * C * B * D * R_pad * I                              # priors MAC
             + num_iterations * (2 * C * B * D * R_pad              # probs*priors
                                 + 3 * C * B * R_pad                # softmax
                                 + 6 * C * B * D)                   # squash
             + (num_iterations - 1) * 2 * C * B * D * R_pad)        # delta logits
    cost = pl.CostEstimate(
        flops=flops,
        transcendentals=num_iterations * C * B * (R_pad + 2),
        bytes_accessed=(x_t.size * x_t.dtype.itemsize
                        + w_prepared.size * w_prepared.dtype.itemsize
                        + C * B * D * 4),
    )

    out = pl.pallas_call(
        kernel,
        out_shape=jax.ShapeDtypeStruct((C, B, D), jnp.float32),
        grid_spec=pltpu.PrefetchScalarGridSpec(
            num_scalar_prefetch=0,
            grid=(num_blocks,),
            in_specs=[
                # x: constant block index -> stays resident in VMEM.
                pl.BlockSpec((I, B, R_pad), lambda c: (0, 0, 0)),
                # One large weight tile per capsule block, pipelined over c.
                pl.BlockSpec((I, Cb, D, R_pad), lambda c: (0, c, 0, 0)),
            ],
            out_specs=pl.BlockSpec((Cb, B, D), lambda c: (c, 0, 0)),
        ),
        compiler_params=pltpu.CompilerParams(
            dimension_semantics=("parallel",)),
        cost_estimate=cost,
    )(x_t, w_prepared)

    return out[:, :, None, None, :]   # (C, B, 1, 1, D)


def _reference(x, route_weights, num_iterations=3):
    """Plain-JAX mirror of the PyTorch forward (routing branch)."""
    # priors[c, b, r, 0, d] = sum_i x[b, r, i] * W[c, r, i, d]
    priors = jnp.sum(
        x[None, :, :, None, :, None] * route_weights[:, None, :, None, :, :],
        axis=-2)                                     # (C, B, R, 1, D)
    logits = jnp.zeros_like(priors)
    outputs = None
    for i in range(num_iterations):
        probs = jax.nn.softmax(logits, axis=2)
        s = jnp.sum(probs * priors, axis=2, keepdims=True)
        sq = jnp.sum(s * s, axis=-1, keepdims=True)
        outputs = (sq / (1.0 + sq)) * s / jnp.sqrt(sq)
        if i != num_iterations - 1:
            logits = logits + jnp.sum(priors * outputs, axis=-1, keepdims=True)
    return outputs                                   # (C, B, 1, 1, D)


if __name__ == "__main__":
    num_capsules = 10
    in_channels = 8
    out_channels = 16
    batch = 2
    num_iterations = 3

    forward = jax.jit(capsule_layer_forward,
                      static_argnames=("num_iterations",))

    key = jax.random.PRNGKey(0)
    # R=128: no lane padding;  R=80: exercises the masked (padded) softmax path.
    for num_route_nodes in (128, 80):
        key, kx, kw = jax.random.split(key, 3)
        x = jax.random.normal(kx, (batch, num_route_nodes, in_channels),
                              jnp.float32)
        route_weights = jax.random.normal(
            kw, (num_capsules, num_route_nodes, in_channels, out_channels),
            jnp.float32)

        # One-time weight relayout, outside the jitted hot path.
        w_prep = prepare_route_weights(route_weights)

        out = forward(x, w_prep, num_iterations=num_iterations)
        out = jax.block_until_ready(out)

        ref = jax.block_until_ready(
            _reference(x, route_weights, num_iterations))
        np.testing.assert_allclose(np.asarray(out), np.asarray(ref),
                                   rtol=2e-3, atol=2e-3)
        assert out.shape == (num_capsules, batch, 1, 1, out_channels)

    print("KERNEL_OK")
</pallas_src>

<mosaic_0001>
module attributes {stable_mosaic.version = 11 : i64} {
  func.func @_capsule_routing_kernel(%arg0: i32, %arg1: memref<8x2x128xf32, #tpu.memory_space<vmem>>, %arg2: memref<8x5x16x128xf32, #tpu.memory_space<vmem>>, %arg3: memref<5x2x16xf32, #tpu.memory_space<vmem>>) attributes {dimension_semantics = [#tpu.dimension_semantics<parallel>], iteration_bounds = array<i64: 2>, scalar_prefetch = 0 : i64, scratch_operands = 0 : i64, tpu.core_type = #tpu.core_type<tc>, window_params = [{pipeline_mode = #tpu.pipeline_mode<synchronous>, transform_indices = @transform_0, window_bounds = array<i64: 8, 2, 128>}, {transform_indices = @transform_1, window_bounds = array<i64: 8, 5, 16, 128>}, {transform_indices = @transform_2, window_bounds = array<i64: 5, 2, 16>}]} {
    %c0 = arith.constant 0 : index
    %c0_0 = arith.constant 0 : index
    %c0_1 = arith.constant 0 : index
    %0 = vector.load %arg1[%c0, %c0_0, %c0_1] : memref<8x2x128xf32, #tpu.memory_space<vmem>>, vector<1x2x128xf32>
    %1 = vector.shape_cast %0 : vector<1x2x128xf32> to vector<2x128xf32>
    %2 = vector.shape_cast %1 : vector<2x128xf32> to vector<1x2x1x128xf32>
    %c0_2 = arith.constant 0 : index
    %c0_3 = arith.constant 0 : index
    %c0_4 = arith.constant 0 : index
    %c0_5 = arith.constant 0 : index
    %3 = vector.load %arg2[%c0_2, %c0_3, %c0_4, %c0_5] : memref<8x5x16x128xf32, #tpu.memory_space<vmem>>, vector<1x5x16x128xf32>
    %4 = vector.shape_cast %3 : vector<1x5x16x128xf32> to vector<5x16x128xf32>
    %5 = vector.shape_cast %4 : vector<5x16x128xf32> to vector<5x1x16x128xf32>
    %6 = vector.broadcast %2 : vector<1x2x1x128xf32> to vector<5x2x16x128xf32>
    %7 = vector.broadcast %5 : vector<5x1x16x128xf32> to vector<5x2x16x128xf32>
    %8 = arith.mulf %6, %7 : vector<5x2x16x128xf32>
    %c1 = arith.constant 1 : index
    %c0_6 = arith.constant 0 : index
    %c0_7 = arith.constant 0 : index
    %9 = vector.load %arg1[%c1, %c0_6, %c0_7] : memref<8x2x128xf32, #tpu.memory_space<vmem>>, vector<1x2x128xf32>
    %10 = vector.shape_cast %9 : vector<1x2x128xf32> to vector<2x128xf32>
    %11 = vector.shape_cast %10 : vector<2x128xf32> to vector<1x2x1x128xf32>
    %c1_8 = arith.constant 1 : index
    %c0_9 = arith.constant 0 : index
    %c0_10 = arith.constant 0 : index
    %c0_11 = arith.constant 0 : index
    %12 = vector.load %arg2[%c1_8, %c0_9, %c0_10, %c0_11] : memref<8x5x16x128xf32, #tpu.memory_space<vmem>>, vector<1x5x16x128xf32>
    %13 = vector.shape_cast %12 : vector<1x5x16x128xf32> to vector<5x16x128xf32>
    %14 = vector.shape_cast %13 : vector<5x16x128xf32> to vector<5x1x16x128xf32>
    %15 = vector.broadcast %11 : vector<1x2x1x128xf32> to vector<5x2x16x128xf32>
    %16 = vector.broadcast %14 : vector<5x1x16x128xf32> to vector<5x2x16x128xf32>
    %17 = arith.mulf %15, %16 : vector<5x2x16x128xf32>
    %18 = arith.addf %8, %17 : vector<5x2x16x128xf32>
    %c2 = arith.constant 2 : index
    %c0_12 = arith.constant 0 : index
    %c0_13 = arith.constant 0 : index
    %19 = vector.load %arg1[%c2, %c0_12, %c0_13] : memref<8x2x128xf32, #tpu.memory_space<vmem>>, vector<1x2x128xf32>
    %20 = vector.shape_cast %19 : vector<1x2x128xf32> to vector<2x128xf32>
    %21 = vector.shape_cast %20 : vector<2x128xf32> to vector<1x2x1x128xf32>
    %c2_14 = arith.constant 2 : index
    %c0_15 = arith.constant 0 : index
    %c0_16 = arith.constant 0 : index
    %c0_17 = arith.constant 0 : index
    %22 = vector.load %arg2[%c2_14, %c0_15, %c0_16, %c0_17] : memref<8x5x16x128xf32, #tpu.memory_space<vmem>>, vector<1x5x16x128xf32>
    %23 = vector.shape_cast %22 : vector<1x5x16x128xf32> to vector<5x16x128xf32>
    %24 = vector.shape_cast %23 : vector<5x16x128xf32> to vector<5x1x16x128xf32>
    %25 = vector.broadcast %21 : vector<1x2x1x128xf32> to vector<5x2x16x128xf32>
    %26 = vector.broadcast %24 : vector<5x1x16x128xf32> to vector<5x2x16x128xf32>
    %27 = arith.mulf %25, %26 : vector<5x2x16x128xf32>
    %28 = arith.addf %18, %27 : vector<5x2x16x128xf32>
    %c3 = arith.constant 3 : index
    %c0_18 = arith.constant 0 : index
    %c0_19 = arith.constant 0 : index
    %29 = vector.load %arg1[%c3, %c0_18, %c0_19] : memref<8x2x128xf32, #tpu.memory_space<vmem>>, vector<1x2x128xf32>
    %30 = vector.shape_cast %29 : vector<1x2x128xf32> to vector<2x128xf32>
    %31 = vector.shape_cast %30 : vector<2x128xf32> to vector<1x2x1x128xf32>
    %c3_20 = arith.constant 3 : index
    %c0_21 = arith.constant 0 : index
    %c0_22 = arith.constant 0 : index
    %c0_23 = arith.constant 0 : index
    %32 = vector.load %arg2[%c3_20, %c0_21, %c0_22, %c0_23] : memref<8x5x16x128xf32, #tpu.memory_space<vmem>>, vector<1x5x16x128xf32>
    %33 = vector.shape_cast %32 : vector<1x5x16x128xf32> to vector<5x16x128xf32>
    %34 = vector.shape_cast %33 : vector<5x16x128xf32> to vector<5x1x16x128xf32>
    %35 = vector.broadcast %31 : vector<1x2x1x128xf32> to vector<5x2x16x128xf32>
    %36 = vector.broadcast %34 : vector<5x1x16x128xf32> to vector<5x2x16x128xf32>
    %37 = arith.mulf %35, %36 : vector<5x2x16x128xf32>
    %38 = arith.addf %28, %37 : vector<5x2x16x128xf32>
    %c4 = arith.constant 4 : index
    %c0_24 = arith.constant 0 : index
    %c0_25 = arith.constant 0 : index
    %39 = vector.load %arg1[%c4, %c0_24, %c0_25] : memref<8x2x128xf32, #tpu.memory_space<vmem>>, vector<1x2x128xf32>
    %40 = vector.shape_cast %39 : vector<1x2x128xf32> to vector<2x128xf32>
    %41 = vector.shape_cast %40 : vector<2x128xf32> to vector<1x2x1x128xf32>
    %c4_26 = arith.constant 4 : index
    %c0_27 = arith.constant 0 : index
    %c0_28 = arith.constant 0 : index
    %c0_29 = arith.constant 0 : index
    %42 = vector.load %arg2[%c4_26, %c0_27, %c0_28, %c0_29] : memref<8x5x16x128xf32, #tpu.memory_space<vmem>>, vector<1x5x16x128xf32>
    %43 = vector.shape_cast %42 : vector<1x5x16x128xf32> to vector<5x16x128xf32>
    %44 = vector.shape_cast %43 : vector<5x16x128xf32> to vector<5x1x16x128xf32>
    %45 = vector.broadcast %41 : vector<1x2x1x128xf32> to vector<5x2x16x128xf32>
    %46 = vector.broadcast %44 : vector<5x1x16x128xf32> to vector<5x2x16x128xf32>
    %47 = arith.mulf %45, %46 : vector<5x2x16x128xf32>
    %48 = arith.addf %38, %47 : vector<5x2x16x128xf32>
    %c5 = arith.constant 5 : index
    %c0_30 = arith.constant 0 : index
    %c0_31 = arith.constant 0 : index
    %49 = vector.load %arg1[%c5, %c0_30, %c0_31] : memref<8x2x128xf32, #tpu.memory_space<vmem>>, vector<1x2x128xf32>
    %50 = vector.shape_cast %49 : vector<1x2x128xf32> to vector<2x128xf32>
    %51 = vector.shape_cast %50 : vector<2x128xf32> to vector<1x2x1x128xf32>
    %c5_32 = arith.constant 5 : index
    %c0_33 = arith.constant 0 : index
    %c0_34 = arith.constant 0 : index
    %c0_35 = arith.constant 0 : index
    %52 = vector.load %arg2[%c5_32, %c0_33, %c0_34, %c0_35] : memref<8x5x16x128xf32, #tpu.memory_space<vmem>>, vector<1x5x16x128xf32>
    %53 = vector.shape_cast %52 : vector<1x5x16x128xf32> to vector<5x16x128xf32>
    %54 = vector.shape_cast %53 : vector<5x16x128xf32> to vector<5x1x16x128xf32>
    %55 = vector.broadcast %51 : vector<1x2x1x128xf32> to vector<5x2x16x128xf32>
    %56 = vector.broadcast %54 : vector<5x1x16x128xf32> to vector<5x2x16x128xf32>
    %57 = arith.mulf %55, %56 : vector<5x2x16x128xf32>
    %58 = arith.addf %48, %57 : vector<5x2x16x128xf32>
    %c6 = arith.constant 6 : index
    %c0_36 = arith.constant 0 : index
    %c0_37 = arith.constant 0 : index
    %59 = vector.load %arg1[%c6, %c0_36, %c0_37] : memref<8x2x128xf32, #tpu.memory_space<vmem>>, vector<1x2x128xf32>
    %60 = vector.shape_cast %59 : vector<1x2x128xf32> to vector<2x128xf32>
    %61 = vector.shape_cast %60 : vector<2x128xf32> to vector<1x2x1x128xf32>
    %c6_38 = arith.constant 6 : index
    %c0_39 = arith.constant 0 : index
    %c0_40 = arith.constant 0 : index
    %c0_41 = arith.constant 0 : index
    %62 = vector.load %arg2[%c6_38, %c0_39, %c0_40, %c0_41] : memref<8x5x16x128xf32, #tpu.memory_space<vmem>>, vector<1x5x16x128xf32>
    %63 = vector.shape_cast %62 : vector<1x5x16x128xf32> to vector<5x16x128xf32>
    %64 = vector.shape_cast %63 : vector<5x16x128xf32> to vector<5x1x16x128xf32>
    %65 = vector.broadcast %61 : vector<1x2x1x128xf32> to vector<5x2x16x128xf32>
    %66 = vector.broadcast %64 : vector<5x1x16x128xf32> to vector<5x2x16x128xf32>
    %67 = arith.mulf %65, %66 : vector<5x2x16x128xf32>
    %68 = arith.addf %58, %67 : vector<5x2x16x128xf32>
    %c7 = arith.constant 7 : index
    %c0_42 = arith.constant 0 : index
    %c0_43 = arith.constant 0 : index
    %69 = vector.load %arg1[%c7, %c0_42, %c0_43] : memref<8x2x128xf32, #tpu.memory_space<vmem>>, vector<1x2x128xf32>
    %70 = vector.shape_cast %69 : vector<1x2x128xf32> to vector<2x128xf32>
    %71 = vector.shape_cast %70 : vector<2x128xf32> to vector<1x2x1x128xf32>
    %c7_44 = arith.constant 7 : index
    %c0_45 = arith.constant 0 : index
    %c0_46 = arith.constant 0 : index
    %c0_47 = arith.constant 0 : index
    %72 = vector.load %arg2[%c7_44, %c0_45, %c0_46, %c0_47] : memref<8x5x16x128xf32, #tpu.memory_space<vmem>>, vector<1x5x16x128xf32>
    %73 = vector.shape_cast %72 : vector<1x5x16x128xf32> to vector<5x16x128xf32>
    %74 = vector.shape_cast %73 : vector<5x16x128xf32> to vector<5x1x16x128xf32>
    %75 = vector.broadcast %71 : vector<1x2x1x128xf32> to vector<5x2x16x128xf32>
    %76 = vector.broadcast %74 : vector<5x1x16x128xf32> to vector<5x2x16x128xf32>
    %77 = arith.mulf %75, %76 : vector<5x2x16x128xf32>
    %78 = arith.addf %68, %77 : vector<5x2x16x128xf32>
    %cst = arith.constant 0.000000e+00 : f32
    %79 = vector.broadcast %cst : f32 to vector<5x2x1x128xf32>
    %cst_48 = arith.constant dense<0xFF800000> : vector<5x2x1xf32>
    %80 = vector.multi_reduction <maximumf>, %79, %cst_48 [3] : vector<5x2x1x128xf32> to vector<5x2x1xf32>
    %81 = vector.shape_cast %80 : vector<5x2x1xf32> to vector<5x2x1x1xf32>
    %82 = vector.broadcast %81 : vector<5x2x1x1xf32> to vector<5x2x1x128xf32>
    %83 = arith.subf %79, %82 : vector<5x2x1x128xf32>
    %84 = math.exp %83 : vector<5x2x1x128xf32>
    %cst_49 = arith.constant dense<0.000000e+00> : vector<5x2x1xf32>
    %85 = vector.multi_reduction <add>, %84, %cst_49 [3] : vector<5x2x1x128xf32> to vector<5x2x1xf32>
    %86 = vector.shape_cast %85 : vector<5x2x1xf32> to vector<5x2x1x1xf32>
    %87 = tpu.reciprocal %86 {approx = true} : vector<5x2x1x1xf32> -> vector<5x2x1x1xf32>
    %88 = vector.broadcast %87 : vector<5x2x1x1xf32> to vector<5x2x1x128xf32>
    %89 = arith.mulf %84, %88 : vector<5x2x1x128xf32>
    %90 = vector.broadcast %89 : vector<5x2x1x128xf32> to vector<5x2x16x128xf32>
    %91 = arith.mulf %90, %78 : vector<5x2x16x128xf32>
    %cst_50 = arith.constant dense<0.000000e+00> : vector<5x2x16xf32>
    %92 = vector.multi_reduction <add>, %91, %cst_50 [3] : vector<5x2x16x128xf32> to vector<5x2x16xf32>
    %93 = vector.shape_cast %92 : vector<5x2x16xf32> to vector<5x2x16x1xf32>
    %94 = arith.mulf %93, %93 : vector<5x2x16x1xf32>
    %cst_51 = arith.constant dense<0.000000e+00> : vector<5x2x1xf32>
    %95 = vector.multi_reduction <add>, %94, %cst_51 [2] : vector<5x2x16x1xf32> to vector<5x2x1xf32>
    %96 = vector.shape_cast %95 : vector<5x2x1xf32> to vector<5x2x1x1xf32>
    %cst_52 = arith.constant 1.000000e+00 : f32
    %97 = vector.broadcast %cst_52 : f32 to vector<5x2x1x1xf32>
    %98 = arith.addf %97, %96 : vector<5x2x1x1xf32>
    %99 = tpu.reciprocal %98 {approx = true} : vector<5x2x1x1xf32> -> vector<5x2x1x1xf32>
    %100 = arith.mulf %96, %99 : vector<5x2x1x1xf32>
    %101 = vector.broadcast %100 : vector<5x2x1x1xf32> to vector<5x2x16x1xf32>
    %102 = arith.mulf %101, %93 : vector<5x2x16x1xf32>
    %cst_53 = arith.constant 1.000000e-30 : f32
    %103 = vector.broadcast %cst_53 : f32 to vector<5x2x1x1xf32>
    %104 = arith.maximumf %96, %103 : vector<5x2x1x1xf32>
    %105 = math.rsqrt %104 : vector<5x2x1x1xf32>
    %106 = vector.broadcast %105 : vector<5x2x1x1xf32> to vector<5x2x16x1xf32>
    %107 = arith.mulf %102, %106 : vector<5x2x16x1xf32>
    %108 = vector.broadcast %107 : vector<5x2x16x1xf32> to vector<5x2x16x128xf32>
    %109 = arith.mulf %78, %108 : vector<5x2x16x128xf32>
    %cst_54 = arith.constant dense<0.000000e+00> : vector<5x2x128xf32>
    %110 = vector.multi_reduction <add>, %109, %cst_54 [2] : vector<5x2x16x128xf32> to vector<5x2x128xf32>
    %111 = vector.shape_cast %110 : vector<5x2x128xf32> to vector<5x2x1x128xf32>
    %112 = arith.addf %79, %111 : vector<5x2x1x128xf32>
    %cst_55 = arith.constant dense<0xFF800000> : vector<5x2x1xf32>
    %113 = vector.multi_reduction <maximumf>, %112, %cst_55 [3] : vector<5x2x1x128xf32> to vector<5x2x1xf32>
    %114 = vector.shape_cast %113 : vector<5x2x1xf32> to vector<5x2x1x1xf32>
    %115 = vector.broadcast %114 : vector<5x2x1x1xf32> to vector<5x2x1x128xf32>
    %116 = arith.subf %112, %115 : vector<5x2x1x128xf32>
    %117 = math.exp %116 : vector<5x2x1x128xf32>
    %cst_56 = arith.constant dense<0.000000e+00> : vector<5x2x1xf32>
    %118 = vector.multi_reduction <add>, %117, %cst_56 [3] : vector<5x2x1x128xf32> to vector<5x2x1xf32>
    %119 = vector.shape_cast %118 : vector<5x2x1xf32> to vector<5x2x1x1xf32>
    %120 = tpu.reciprocal %119 {approx = true} : vector<5x2x1x1xf32> -> vector<5x2x1x1xf32>
    %121 = vector.broadcast %120 : vector<5x2x1x1xf32> to vector<5x2x1x128xf32>
    %122 = arith.mulf %117, %121 : vector<5x2x1x128xf32>
    %123 = vector.broadcast %122 : vector<5x2x1x128xf32> to vector<5x2x16x128xf32>
    %124 = arith.mulf %123, %78 : vector<5x2x16x128xf32>
    %cst_57 = arith.constant dense<0.000000e+00> : vector<5x2x16xf32>
    %125 = vector.multi_reduction <add>, %124, %cst_57 [3] : vector<5x2x16x128xf32> to vector<5x2x16xf32>
    %126 = vector.shape_cast %125 : vector<5x2x16xf32> to vector<5x2x16x1xf32>
    %127 = arith.mulf %126, %126 : vector<5x2x16x1xf32>
    %cst_58 = arith.constant dense<0.000000e+00> : vector<5x2x1xf32>
    %128 = vector.multi_reduction <add>, %127, %cst_58 [2] : vector<5x2x16x1xf32> to vector<5x2x1xf32>
    %129 = vector.shape_cast %128 : vector<5x2x1xf32> to vector<5x2x1x1xf32>
    %cst_59 = arith.constant 1.000000e+00 : f32
    %130 = vector.broadcast %cst_59 : f32 to vector<5x2x1x1xf32>
    %131 = arith.addf %130, %129 : vector<5x2x1x1xf32>
    %132 = tpu.reciprocal %131 {approx = true} : vector<5x2x1x1xf32> -> vector<5x2x1x1xf32>
    %133 = arith.mulf %129, %132 : vector<5x2x1x1xf32>
    %134 = vector.broadcast %133 : vector<5x2x1x1xf32> to vector<5x2x16x1xf32>
    %135 = arith.mulf %134, %126 : vector<5x2x16x1xf32>
    %cst_60 = arith.constant 1.000000e-30 : f32
    %136 = vector.broadcast %cst_60 : f32 to vector<5x2x1x1xf32>
    %137 = arith.maximumf %129, %136 : vector<5x2x1x1xf32>
    %138 = math.rsqrt %137 : vector<5x2x1x1xf32>
    %139 = vector.broadcast %138 : vector<5x2x1x1xf32> to vector<5x2x16x1xf32>
    %140 = arith.mulf %135, %139 : vector<5x2x16x1xf32>
    %141 = vector.broadcast %140 : vector<5x2x16x1xf32> to vector<5x2x16x128xf32>
    %142 = arith.mulf %78, %141 : vector<5x2x16x128xf32>
    %cst_61 = arith.constant dense<0.000000e+00> : vector<5x2x128xf32>
    %143 = vector.multi_reduction <add>, %142, %cst_61 [2] : vector<5x2x16x128xf32> to vector<5x2x128xf32>
    %144 = vector.shape_cast %143 : vector<5x2x128xf32> to vector<5x2x1x128xf32>
    %145 = arith.addf %112, %144 : vector<5x2x1x128xf32>
    %cst_62 = arith.constant dense<0xFF800000> : vector<5x2x1xf32>
    %146 = vector.multi_reduction <maximumf>, %145, %cst_62 [3] : vector<5x2x1x128xf32> to vector<5x2x1xf32>
    %147 = vector.shape_cast %146 : vector<5x2x1xf32> to vector<5x2x1x1xf32>
    %148 = vector.broadcast %147 : vector<5x2x1x1xf32> to vector<5x2x1x128xf32>
    %149 = arith.subf %145, %148 : vector<5x2x1x128xf32>
    %150 = math.exp %149 : vector<5x2x1x128xf32>
    %cst_63 = arith.constant dense<0.000000e+00> : vector<5x2x1xf32>
    %151 = vector.multi_reduction <add>, %150, %cst_63 [3] : vector<5x2x1x128xf32> to vector<5x2x1xf32>
    %152 = vector.shape_cast %151 : vector<5x2x1xf32> to vector<5x2x1x1xf32>
    %153 = tpu.reciprocal %152 {approx = true} : vector<5x2x1x1xf32> -> vector<5x2x1x1xf32>
    %154 = vector.broadcast %153 : vector<5x2x1x1xf32> to vector<5x2x1x128xf32>
    %155 = arith.mulf %150, %154 : vector<5x2x1x128xf32>
    %156 = vector.broadcast %155 : vector<5x2x1x128xf32> to vector<5x2x16x128xf32>
    %157 = arith.mulf %156, %78 : vector<5x2x16x128xf32>
    %cst_64 = arith.constant dense<0.000000e+00> : vector<5x2x16xf32>
    %158 = vector.multi_reduction <add>, %157, %cst_64 [3] : vector<5x2x16x128xf32> to vector<5x2x16xf32>
    %159 = vector.shape_cast %158 : vector<5x2x16xf32> to vector<5x2x16x1xf32>
    %160 = arith.mulf %159, %159 : vector<5x2x16x1xf32>
    %cst_65 = arith.constant dense<0.000000e+00> : vector<5x2x1xf32>
    %161 = vector.multi_reduction <add>, %160, %cst_65 [2] : vector<5x2x16x1xf32> to vector<5x2x1xf32>
    %162 = vector.shape_cast %161 : vector<5x2x1xf32> to vector<5x2x1x1xf32>
    %cst_66 = arith.constant 1.000000e+00 : f32
    %163 = vector.broadcast %cst_66 : f32 to vector<5x2x1x1xf32>
    %164 = arith.addf %163, %162 : vector<5x2x1x1xf32>
    %165 = tpu.reciprocal %164 {approx = true} : vector<5x2x1x1xf32> -> vector<5x2x1x1xf32>
    %166 = arith.mulf %162, %165 : vector<5x2x1x1xf32>
    %167 = vector.broadcast %166 : vector<5x2x1x1xf32> to vector<5x2x16x1xf32>
    %168 = arith.mulf %167, %159 : vector<5x2x16x1xf32>
    %cst_67 = arith.constant 1.000000e-30 : f32
    %169 = vector.broadcast %cst_67 : f32 to vector<5x2x1x1xf32>
    %170 = arith.maximumf %162, %169 : vector<5x2x1x1xf32>
    %171 = math.rsqrt %170 : vector<5x2x1x1xf32>
    %172 = vector.broadcast %171 : vector<5x2x1x1xf32> to vector<5x2x16x1xf32>
    %173 = arith.mulf %168, %172 : vector<5x2x16x1xf32>
    %174 = vector.shape_cast %173 : vector<5x2x16x1xf32> to vector<5x2x16xf32>
    %c0_68 = arith.constant 0 : index
    %c0_69 = arith.constant 0 : index
    %c0_70 = arith.constant 0 : index
    %175 = vector.load %arg3[%c0_68, %c0_69, %c0_70] : memref<5x2x16xf32, #tpu.memory_space<vmem>>, vector<5x2x16xf32>
    tpu.vector_store %arg3[%c0_68, %c0_69, %c0_70], %174 {strides = array<i32>} : memref<5x2x16xf32, #tpu.memory_space<vmem>>, vector<5x2x16xf32>,
    return
  }
  func.func @transform_0(%arg0: i32) -> (i32, i32, i32) {
    %c0_i32 = arith.constant 0 : i32
    %c0_i32_0 = arith.constant 0 : i32
    %c0_i32_1 = arith.constant 0 : i32
    %c0_i32_2 = arith.constant 0 : i32
    return %c0_i32, %c0_i32_0, %c0_i32_1 : i32, i32, i32
  }
  func.func @transform_1(%arg0: i32) -> (i32, i32, i32, i32) {
    %c0_i32 = arith.constant 0 : i32
    %c0_i32_0 = arith.constant 0 : i32
    %c0_i32_1 = arith.constant 0 : i32
    %c0_i32_2 = arith.constant 0 : i32
    return %c0_i32, %arg0, %c0_i32_0, %c0_i32_1 : i32, i32, i32, i32
  }
  func.func @transform_2(%arg0: i32) -> (i32, i32, i32) {
    %c0_i32 = arith.constant 0 : i32
    %c0_i32_0 = arith.constant 0 : i32
    %c0_i32_1 = arith.constant 0 : i32
    return %arg0, %c0_i32, %c0_i32_0 : i32, i32, i32
  }
}

</mosaic_0001>

<bundles_post_ra>
// kernel: capsule_layer_forward.1
= control target key start
LH: loop header
LB: loop body
LE: loop exit
PB: predicated region body
PF: predicated region fallthrough
CT: control target
= control target key end

     0   :  { %7 = vsyncpa [#allocation3], 0  ;;  %s3968_s0 = inlined_call_operand.vmem [shape: f32[8,2,128], index: 0, kind: input, shape index: {}]   ;;  %s3969_s1 = inlined_call_operand.hbm [shape: f32[8,10,16,128], index: 1, kind: input, shape index: {}]   ;;  %s3970_s2 = inlined_call_operand.hbm [shape: f32[10,2,16], index: 2, kind: output, shape index: {}]  }
   0x1   :  { %9 = vsyncpa [#allocation3 + $0x1], 0 }
   0x2   :  { %10 = vsyncpa [#allocation4], 0 }
   0x3   :  { %12 = vsyncpa [#allocation4 + $0x1], 0  ;;  %s2634_s9 = smov 0   ;;  %s2636_s10 = smov 0  }
   0x4   :  { %s2638_s11 = smov 0   ;;  %s2640_s12 = smov 0  }
   0x5 LB: > { %s2655_s13 = sadd.s32 4294967295, %s2606_s12   ;;  %s2177_s14 = sadd.s32 4294967294, %s2606_s12   ;;  %s2606_s12 = sphi %s2640_s12, %s4066_s12   ;;  %s2602_s11 = sphi %s2638_s11, %s4065_s11   ;;  %s2598_s10 = sphi %s2636_s10, %s4064_s10   ;;  %s2594_s9 = sphi %s2634_s9, %s4063_s9  }
   0x6   : > { %s2659_s15 = sadd.s32 1, %s2606_s12   ;;  %s46_s16 = sadd.s32 1, %s2602_s11 }
   0x7   : > { %s43_s17 = ssub.s32 %s2606_s12, %s2659_s15  ;;  %p53_p0 = scmp.ne.s32.totalorder %s2602_s11, %s2598_s10 }
   0x8   : > { %p44_p1 = scmp.eq.s32.totalorder %s43_s17, 0  ;;  %p54_p2 = scmp.eq.s32.totalorder %s2606_s12, 0 }
   0x9   : > { %p59_p3 = scmp.ne.s32.totalorder %s2598_s10, %s2594_s9  ;;  %p60_p4 = scmp.eq.s32.totalorder %s2655_s13, 0 }
   0xa   : > { %s2671_s18 = scalar_select %p44_p1, %s2602_s11, %s46_s16  }
   0xb   : > { %p2673_p5 = por %p54_p2, %p53_p0  ;;  %p2677_p6 = por %p60_p4, %p59_p3 }
   0xc   : > { %p83_p7 = scmp.eq.s32.totalorder %s2655_s13, 1  ;;  %p89_p8 = scmp.eq.s32.totalorder %s2177_s14, 1 }
   0xd   : > { %p2179_p11 = scmp.ge.s32.totalorder %s2606_s12, 2 }
   0xe   : > { %p2682_p9 = por %p83_p7, %p53_p0  ;;  %p2686_p10 = por %p89_p8, %p59_p3 }
   0xf   : > { %108 = sbr.rel (%p2179_p11) target bundleno = 36 (0x24), region = 20 }
  0x16   : > { %s112_s23 = sand.u32 1, %s2602_s11   ;;  %s2276_s24 = smul.u32 1280, %s2606_s12 }
  0x17   : > { %s2277_s25 = smul.u32 640, %s112_s23  ;;  %s2608_s26 = smov 2560  }
  0x18   : > { %2281 = sst [smem:[#allocation7]] (%p2673_p5), %s2608_s26  ;;  %s123_s30 = scalar_lea.hbm %s3969_s1, %s2276_s24 }
  0x19   : > { %s2280_s27 = scalar_select %p2673_p5, [#allocation0], [#allocation8] }
  0x1a   : > { %s116_s4 = scalar_lea.vmem [#allocation2], %s2277_s25  ;;  %s2609_s6 = smov 1280  }
  0x1b   : > { %s128_s3 = sld [smem:[%s2280_s27]]   ;;  %s136_s5 = sshll.u32 %s116_s4, 4  ;;  %s137_s5 = int_to_ptr.vmem [resolvable:$true] %s136_s5 }
  0x1c   : > { %2282 = sst [smem:[#allocation7 + $0x1]] (%p2673_p5), %s2609_s6  ;;  %s2610_s7 = smov 10  }
  0x1d   : > { %2283 = sst [smem:[#allocation7 + $0x2]] (%p2673_p5), %s2610_s7  ;;  %s2611_s8 = smov 128  }
  0x1e   : > { %2284 = sst [smem:[#allocation7 + $0x3]] (%p2673_p5), %s2611_s8  ;;  %s2612_s14 = smov 8  }
  0x1f   : > { %2285 = sst [smem:[#allocation7 + $0x4]] (%p2673_p5), %s2611_s8  ;;  %s113_s24 = scalar_lea.sflag [#allocation3], %s112_s23 }
  0x20   : > { %2286 = sst [smem:[#allocation7 + $0x5]] (%p2673_p5), %s2612_s14  ;;  %s2613_s25 = smov [#allocation6]  }
  0x21   : > { %s2182_s16 = sshll.u32 %s128_s3, 26 }
  0x22   : > { %s2183_s17 = sadd.s32 134217728, %s2182_s16 }
  0x23   : > { %2287 = dma.general (%p2673_p5), %s123_s30, 10240, %s137_s5, %s113_s24, %s2613_s25, [#allocation7], %s2183_s17, 0  }
  0x24 PF: > { %p2184_p12 = scmp.ge.s32.totalorder %s2606_s12, 1  ;;  %p157_p13 = scmp.lt.s32.totalorder %s2606_s12, 3 }
  0x26   : > { %p158_p0 = pnand %p2184_p12, %p157_p13 }
  0x28   : > { %161 = sbr.rel (%p158_p0) target bundleno = 1490 (0x5d2), region = 28 }
  0x2f   : > { %s2717_s26 = sand.u32 1, %s2598_s10  }
  0x30   : > { %s2278_s27 = smul.u32 640, %s2717_s26  ;;  %s164_s28 = scalar_lea.sflag [#allocation3], %s2717_s26 }
  0x32   : > { %s2721_s29 = scalar_lea.vmem [#allocation2], %s2278_s27 }
  0x33   : > { %2585 = dma.done.wait (%p2677_p6), %s164_s28, 10240  }
  0x34   : > { %2587 = vsyncadd (%p2677_p6), %s164_s28, 4294957056  ;;  %v2614_v0 = vmov 1.0   ;;  %v2615_v1 = vmov 1966171168   ;;  %v3971_v3 = vlaneseq  ;;  %v215_v16 = vld [vmem:[%s2721_s29 + $0x8] sm:$0xff]  ;;  %v2189_v19 = vld [vmem:[%s2721_s29 + $0x58] sm:$0xff] }
  0x35   : > { %856 = vadd.xlane.f32.xlu0 %v2614_v0  ;;  %v201_v2 = vunpack.c.l.s4 %v2615_v1  ;;  %v2185_v7 = vld.sshfl [vmem:[%s3968_s0] sm:$0x11 pattern:$0x75316420]  ;;  %v2760_v21 = vld [vmem:[%s2721_s29 + $0x50] sm:$0xff]  ;;  %v2201_v32 = vld [vmem:[%s2721_s29 + $0xa8] sm:$0xff] }
  0x36   : > { %v2728_v5 = vshrl.u32 %v3971_v3, 7  ;;  %v2187_v10 = vld.sshfl [vmem:[%s3968_s0 + $0x2] sm:$0x11 pattern:$0x75316420]  ;;  %v199_v15 = vcombine.high %v2185_v7, %v2185_v7  ;;  %v2213_v45 = vld [vmem:[%s2721_s29 + $0xf8] sm:$0xff] }
  0x37   : > { %v202_v4 = vunpack.c.0.s8 %v201_v2  ;;  %v264_v13 = vcombine.high %v2187_v10, %v2187_v10  ;;  %v2199_v14 = vld.sshfl [vmem:[%s3968_s0 + $0x4] sm:$0x11 pattern:$0x75316420]  ;;  %v2803_v47 = vld [vmem:[%s2721_s29 + $0xf0] sm:$0xff]  ;;  %v2225_v51 = vld [vmem:[%s2721_s29 + $0x148] sm:$0xff] }
  0x38   : > { %4007 = vst [vmem:[#allocation11_spill] sm:$0xff] %v2728_v5  ;;  %v2738_v9 = vsub.s32 0, %v2728_v5  ;;  %v2757_v20 = vld [vmem:[%s2721_s29] sm:$0xff]  ;;  %v350_v22 = vcombine.high %v2199_v14, %v2199_v14  ;;  %vm1990_vm0 = vcmask 130112   ;;  %vm2073_vm1 = vcmask 1041409   ;;  %s2279_s28 = smul.u32 10, %s2717_s26 }
  0x39   : > { %v2731_v6 = vsub.s32 %v202_v4, %v2728_v5  ;;  %v2211_v23 = vld.sshfl [vmem:[%s3968_s0 + $0x6] sm:$0x11 pattern:$0x75316420]  ;;  %vm2084_vm2 = vcmask 123904   ;;  %s2275_s19 = smul.u32 160, %s2655_s13 }
  0x3a   : > { %v2223_v33 = vld.sshfl [vmem:[%s3968_s0 + $0x8] sm:$0x11 pattern:$0x75316420]  ;;  %v2782_v34 = vld [vmem:[%s2721_s29 + $0xa0] sm:$0xff]  ;;  %v436_v35 = vcombine.high %v2211_v23, %v2211_v23  ;;  %s2091_s13 = scalar_lea.sflag [#allocation4], %s2717_s26 }
  0x3b   : > { %v206_v8 = vrot.slane %v2185_v7, %v2731_v6  ;;  %v271_v11 = vrot.slane %v2187_v10, %v2731_v6  ;;  %v357_v18 = vrot.slane %v2199_v14, %v2731_v6  ;;  %v443_v25 = vrot.slane %v2211_v23, %v2731_v6  ;;  %v2235_v46 = vld.sshfl [vmem:[%s3968_s0 + $0xa] sm:$0x11 pattern:$0x75316420]  ;;  %v2823_v61 = vld [vmem:[%s2721_s29 + $0x140] sm:$0xff]  ;;  %v2237_v14 = vld [vmem:[%s2721_s29 + $0x198] sm:$0xff]  ;;  %s3917_s3 = scalar_lea.hbm %s3970_s2, %s2275_s19 }
  0x3c   : > { %v213_v26 = vrot.slane %v199_v15, %v2731_v6  ;;  %v278_v27 = vrot.slane %v264_v13, %v2731_v6  ;;  %v529_v36 = vrot.slane %v2223_v33, %v2731_v6  ;;  %v364_v40 = vrot.slane %v350_v22, %v2731_v6  ;;  %v2247_v60 = vld.sshfl [vmem:[%s3968_s0 + $0xc] sm:$0x11 pattern:$0x75316420]  ;;  %s2616_s5 = smov [#allocation5]  }
  0x3d   : > { %v2745_v12 = vrot.slane %v206_v8, %v2738_v9  ;;  %v2752_v17 = vrot.slane %v271_v11, %v2738_v9  ;;  %v2771_v29 = vrot.slane %v357_v18, %v2738_v9  ;;  %v2786_v37 = vrot.slane %v443_v25, %v2738_v9  ;;  %v2259_v15 = vld.sshfl [vmem:[%s3968_s0 + $0xe] sm:$0x11 pattern:$0x75316420]  ;;  %s2544_s6 = sshll.u32 %s2616_s5, 4  ;;  %s2545_s6 = int_to_ptr.vmem [resolvable:$false] %s2544_s6 }
  0x3e   : > { %v2789_v38 = vrot.slane %v213_v26, %v2738_v9  ;;  %v2792_v39 = vrot.slane %v278_v27, %v2738_v9  ;;  %v522_v48 = vcombine.high %v2223_v33, %v2223_v33  ;;  %v2806_v49 = vrot.slane %v529_v36, %v2738_v9  ;;  %s2546_s7 = scalar_lea.vmem %s2545_s6, 320 }
  0x3f   : > { %4008 = vst [vmem:[#allocation12_spill] sm:$0xff] %v2752_v17  ;;  %v235_v24 = vmul.f32 %v2745_v12, %v215_v16  ;;  %v301_v28 = vmul.f32 %v2189_v19, %v2752_v17  ;;  %v234_v30 = vmul.f32 %v2745_v12, %v2757_v20  ;;  %v300_v31 = vmul.f32 %v2760_v21, %v2752_v17 }
  0x40   : > { %v387_v42 = vmul.f32 %v2201_v32, %v2771_v29  ;;  %v386_v44 = vmul.f32 %v2782_v34, %v2771_v29  ;;  %v615_v50 = vrot.slane %v2235_v46, %v2731_v6  ;;  %v237_v52 = vmul.f32 %v2789_v38, %v215_v16  ;;  %v2236_v16 = vld [vmem:[%s2721_s29 + $0x190] sm:$0xff] }
  0x41   : > { %v321_v41 = vadd.f32 %v301_v28, %v235_v24  ;;  %v320_v43 = vadd.f32 %v300_v31, %v234_v30  ;;  %v303_v53 = vmul.f32 %v2189_v19, %v2792_v39  ;;  %v2813_v54 = vrot.slane %v364_v40, %v2738_v9  ;;  %v2249_v30 = vld [vmem:[%s2721_s29 + $0x1e8] sm:$0xff] }
  0x42   : > { %v450_v55 = vrot.slane %v436_v35, %v2731_v6  ;;  %v473_v57 = vmul.f32 %v2213_v45, %v2786_v37  ;;  %v472_v59 = vmul.f32 %v2803_v47, %v2786_v37  ;;  %v559_v62 = vmul.f32 %v2225_v51, %v2806_v49  ;;  %v2248_v35 = vld [vmem:[%s2721_s29 + $0x1e0] sm:$0xff] }
  0x43   : > { %v407_v56 = vadd.f32 %v387_v42, %v321_v41  ;;  %v406_v58 = vadd.f32 %v386_v44, %v320_v43  ;;  %v608_v63 = vcombine.high %v2235_v46, %v2235_v46  ;;  %v701_v0 = vrot.slane %v2247_v60, %v2731_v6 }
  0x44   : > { %v323_v1 = vadd.f32 %v303_v53, %v237_v52  ;;  %v389_v2 = vmul.f32 %v2201_v32, %v2813_v54  ;;  %v2829_v4 = vrot.slane %v450_v55, %v2738_v9  ;;  %v536_v7 = vrot.slane %v522_v48, %v2731_v6  ;;  %v2260_v52 = vld [vmem:[%s2721_s29 + $0x230] sm:$0xff] }
  0x45   : > { %v493_v8 = vadd.f32 %v473_v57, %v407_v56  ;;  %v2833_v10 = vrot.slane %v615_v50, %v2738_v9  ;;  %v492_v11 = vadd.f32 %v472_v59, %v406_v58  ;;  %v558_v13 = vmul.f32 %v2823_v61, %v2806_v49  ;;  %v2261_v50 = vld [vmem:[%s2721_s29 + $0x238] sm:$0xff] }
  0x46   : > { %v694_v18 = vcombine.high %v2247_v60, %v2247_v60  ;;  %v2843_v19 = vrot.slane %v701_v0, %v2738_v9  ;;  %v787_v22 = vrot.slane %v2259_v15, %v2731_v6  ;;  %v409_v23 = vadd.f32 %v389_v2, %v323_v1  ;;  %v217_v59 = vld [vmem:[%s2721_s29 + $0x18] sm:$0xff]  ;;  %v2191_v0 = vld [vmem:[%s2721_s29 + $0x68] sm:$0xff]  ;;  %v216_v1 = vld [vmem:[%s2721_s29 + $0x10] sm:$0xff] }
  0x47   : > { %4009 = vst [vmem:[#allocation13_spill] sm:$0xff] %v2833_v10  ;;  %v475_v24 = vmul.f32 %v2213_v45, %v2829_v4  ;;  %v2848_v25 = vrot.slane %v536_v7, %v2738_v9  ;;  %v622_v26 = vrot.slane %v608_v63, %v2731_v6  ;;  %v579_v27 = vadd.f32 %v559_v62, %v493_v8  ;;  %v2190_v2 = vld [vmem:[%s2721_s29 + $0x60] sm:$0xff] }
  0x48   : > { %4010 = vst [vmem:[#allocation14_spill] sm:$0xff] %v2843_v19  ;;  %v645_v28 = vmul.f32 %v2237_v14, %v2833_v10  ;;  %v578_v31 = vadd.f32 %v558_v13, %v492_v11  ;;  %v644_v32 = vmul.f32 %v2236_v16, %v2833_v10  ;;  %v780_v33 = vcombine.high %v2259_v15, %v2259_v15  ;;  %v2203_v15 = vld [vmem:[%s2721_s29 + $0xb8] sm:$0xff] }
  0x49   : > { %v708_v36 = vrot.slane %v694_v18, %v2731_v6  ;;  %v731_v40 = vmul.f32 %v2249_v30, %v2843_v19  ;;  %v495_v41 = vadd.f32 %v475_v24, %v409_v23  ;;  %v561_v42 = vmul.f32 %v2225_v51, %v2848_v25 }
  0x4a   : > { %v2859_v43 = vrot.slane %v622_v26, %v2738_v9  ;;  %v665_v44 = vadd.f32 %v645_v28, %v579_v27  ;;  %v2862_v45 = vrot.slane %v787_v22, %v2738_v9  ;;  %v664_v46 = vadd.f32 %v644_v32, %v578_v31  ;;  %v2202_v26 = vld [vmem:[%s2721_s29 + $0xb0] sm:$0xff]  ;;  %v2908_v31 = vld [vmem:[%s2721_s29 + $0x158] sm:$0xff] }
  0x4b   : > { %v730_v48 = vmul.f32 %v2248_v35, %v2843_v19  ;;  %v794_v53 = vrot.slane %v780_v33, %v2731_v6  ;;  %v2869_v55 = vrot.slane %v708_v36, %v2738_v9  ;;  %v236_v51 = vmul.f32 %v2789_v38, %v2757_v20 }
  0x4c   : > { %4011 = vst [vmem:[#allocation15_spill] sm:$0xff] %v2862_v45  ;;  %v302_v56 = vmul.f32 %v2760_v21, %v2792_v39  ;;  %v581_v57 = vadd.f32 %v561_v42, %v495_v41  ;;  %v647_v58 = vmul.f32 %v2237_v14, %v2859_v43  ;;  %v751_v60 = vadd.f32 %v731_v40, %v665_v44  ;;  %v219_v41 = vld [vmem:[%s2721_s29 + $0x28] sm:$0xff] }
  0x4d   : > { %v817_v62 = vmul.f32 %v2261_v50, %v2862_v45  ;;  %v750_v63 = vadd.f32 %v730_v48, %v664_v46  ;;  %v816_v6 = vmul.f32 %v2260_v52, %v2862_v45  ;;  %v2883_v20 = vrot.slane %v794_v53, %v2738_v9  ;;  %v2922_v46 = vld [vmem:[%s2721_s29 + $0x1a8] sm:$0xff]  ;;  %v2925_v48 = vld [vmem:[%s2721_s29 + $0x1f8] sm:$0xff] }
  0x4e   : > { %v733_v21 = vmul.f32 %v2249_v30, %v2869_v55  ;;  %v322_v7 = vadd.f32 %v302_v56, %v236_v51  ;;  %v388_v8 = vmul.f32 %v2782_v34, %v2813_v54  ;;  %v239_v11 = vmul.f32 %v2745_v12, %v217_v59  ;;  %v2215_v30 = vld [vmem:[%s2721_s29 + $0x108] sm:$0xff]  ;;  %v2214_v56 = vld [vmem:[%s2721_s29 + $0x100] sm:$0xff] }
  0x4f   : > { %v667_v13 = vadd.f32 %v647_v58, %v581_v57  ;;  %v305_v14 = vmul.f32 %v2191_v0, %v2752_v17  ;;  %v238_v18 = vmul.f32 %v2745_v12, %v216_v1  ;;  %v304_v22 = vmul.f32 %v2190_v2, %v2752_v17 }
  0x50   : > { %v2893_v9 = vadd.f32 %v817_v62, %v751_v60  ;;  %v2895_v23 = vadd.f32 %v816_v6, %v750_v63  ;;  %v474_v24 = vmul.f32 %v2803_v47, %v2829_v4  ;;  %v560_v34 = vmul.f32 %v2823_v61, %v2848_v25  ;;  %v218_v6 = vld [vmem:[%s2721_s29 + $0x20] sm:$0xff] }
  0x51   : > { %v819_v27 = vmul.f32 %v2261_v50, %v2883_v20  ;;  %v2904_v28 = vmul.f32 %v2236_v16, %v2859_v43  ;;  %v241_v32 = vmul.f32 %v2789_v38, %v217_v59  ;;  %v307_v33 = vmul.f32 %v2191_v0, %v2792_v39  ;;  %v2193_v16 = vld [vmem:[%s2721_s29 + $0x78] sm:$0xff]  ;;  %v2928_v50 = vld [vmem:[%s2721_s29 + $0x248] sm:$0xff]  ;;  %v2192_v0 = vld [vmem:[%s2721_s29 + $0x70] sm:$0xff] }
  0x52   : > { %4012 = vst [vmem:[#allocation16_spill] sm:$0xff] %v2893_v9  ;;  %4013 = vst [vmem:[#allocation17_spill] sm:$0xff] %v2895_v23  ;;  %v408_v47 = vadd.f32 %v388_v8, %v322_v7  ;;  %v2913_v61 = vmul.f32 %v2248_v35, %v2869_v55  ;;  %v2916_v36 = vmul.f32 %v2260_v52, %v2883_v20  ;;  %v2205_v8 = vld [vmem:[%s2721_s29 + $0xc8] sm:$0xff] }
  0x53   : > { %v391_v40 = vmul.f32 %v2203_v15, %v2771_v29  ;;  %v753_v42 = vadd.f32 %v733_v21, %v667_v13  ;;  %v325_v44 = vadd.f32 %v305_v14, %v239_v11  ;;  %v324_v53 = vadd.f32 %v304_v22, %v238_v18  ;;  %v2226_v18 = vld [vmem:[%s2721_s29 + $0x150] sm:$0xff]  ;;  %v2238_v22 = vld [vmem:[%s2721_s29 + $0x1a0] sm:$0xff] }
  0x54   : > { %4014 = vst [vmem:[#allocation18_spill] sm:$0xff] %v2916_v36  ;;  %v390_v35 = vmul.f32 %v2202_v26, %v2771_v29  ;;  %v477_v52 = vmul.f32 %v2215_v30, %v2786_v37  ;;  %v563_v51 = vmul.f32 %v2908_v31, %v2806_v49  ;;  %v240_v57 = vmul.f32 %v2789_v38, %v216_v1 }
  0x55   : > { %v306_v58 = vmul.f32 %v2190_v2, %v2792_v39  ;;  %v327_v59 = vadd.f32 %v307_v33, %v241_v32  ;;  %v393_v60 = vmul.f32 %v2203_v15, %v2813_v54  ;;  %v243_v62 = vmul.f32 %v2745_v12, %v219_v41 }
  0x56   : > { %v309_v63 = vmul.f32 %v2193_v16, %v2752_v17  ;;  %v494_v21 = vadd.f32 %v474_v24, %v408_v47  ;;  %v2944_v7 = vmul.f32 %v2922_v46, %v2833_v10  ;;  %v2948_v1 = vmul.f32 %v2925_v48, %v2843_v19  ;;  %v2961_v24 = vld [vmem:[%s2721_s29 + $0x1f0] sm:$0xff] }
  0x57   : > { %v2952_v2 = vmul.f32 %v2928_v50, %v2862_v45  ;;  %v2955_v11 = vadd.f32 %v819_v27, %v753_v42  ;;  %v411_v13 = vadd.f32 %v391_v40, %v325_v44  ;;  %v410_v14 = vadd.f32 %v390_v35, %v324_v53  ;;  %v2204_v44 = vld [vmem:[%s2721_s29 + $0xc0] sm:$0xff] }
  0x58   : > { %v476_v15 = vmul.f32 %v2214_v56, %v2786_v37  ;;  %v326_v32 = vadd.f32 %v306_v58, %v240_v57  ;;  %v392_v33 = vmul.f32 %v2202_v26, %v2813_v54  ;;  %v242_v47 = vmul.f32 %v2745_v12, %v218_v6 }
  0x59   : > { %4015 = vst [vmem:[#allocation19_spill] sm:$0xff] %v2952_v2  ;;  %4016 = vst [vmem:[#allocation20_spill] sm:$0xff] %v2955_v11  ;;  %v308_v3 = vmul.f32 %v2192_v0, %v2752_v17  ;;  %v413_v5 = vadd.f32 %v393_v60, %v327_v59  ;;  %v479_v27 = vmul.f32 %v2215_v30, %v2829_v4  ;;  %v2217_v11 = vld [vmem:[%s2721_s29 + $0x118] sm:$0xff]  ;;  %v2977_v60 = vld [vmem:[%s2721_s29 + $0x240] sm:$0xff] }
  0x5a   : > { %v329_v40 = vadd.f32 %v309_v63, %v243_v62  ;;  %v395_v42 = vmul.f32 %v2205_v8, %v2771_v29  ;;  %v562_v53 = vmul.f32 %v2226_v18, %v2806_v49  ;;  %v648_v35 = vmul.f32 %v2238_v22, %v2833_v10 }
  0x5b   : > { %v245_v26 = vmul.f32 %v2789_v38, %v219_v41  ;;  %v311_v57 = vmul.f32 %v2193_v16, %v2792_v39  ;;  %v580_v58 = vadd.f32 %v560_v34, %v494_v21  ;;  %v497_v23 = vadd.f32 %v477_v52, %v411_v13  ;;  %v2216_v16 = vld [vmem:[%s2721_s29 + $0x110] sm:$0xff]  ;;  %v2229_v52 = vld [vmem:[%s2721_s29 + $0x168] sm:$0xff] }
  0x5c   : > { %v496_v59 = vadd.f32 %v476_v15, %v410_v14  ;;  %v734_v30 = vmul.f32 %v2961_v24, %v2843_v19  ;;  %v412_v62 = vadd.f32 %v392_v33, %v326_v32  ;;  %v478_v63 = vmul.f32 %v2214_v56, %v2829_v4 }
  0x5d   : > { %v328_v9 = vadd.f32 %v308_v3, %v242_v47  ;;  %v394_v2 = vmul.f32 %v2204_v44, %v2771_v29  ;;  %v499_v36 = vadd.f32 %v479_v27, %v413_v5  ;;  %v565_v41 = vmul.f32 %v2908_v31, %v2848_v25 }
  0x5e   : > { %v415_v17 = vadd.f32 %v395_v42, %v329_v40  ;;  %v481_v34 = vmul.f32 %v2217_v11, %v2786_v37  ;;  %v331_v21 = vadd.f32 %v311_v57, %v245_v26  ;;  %v397_v13 = vmul.f32 %v2205_v8, %v2813_v54 }
  0x5f   : > { %v244_v14 = vmul.f32 %v2789_v38, %v218_v6  ;;  %v310_v3 = vmul.f32 %v2192_v0, %v2792_v39  ;;  %v666_v56 = vadd.f32 %v2904_v28, %v580_v58  ;;  %v583_v5 = vadd.f32 %v563_v51, %v497_v23  ;;  %v2228_v23 = vld [vmem:[%s2721_s29 + $0x160] sm:$0xff]  ;;  %v2241_v28 = vld [vmem:[%s2721_s29 + $0x1b8] sm:$0xff] }
  0x60   : > { %v582_v15 = vadd.f32 %v562_v53, %v496_v59  ;;  %v820_v31 = vmul.f32 %v2977_v60, %v2862_v45  ;;  %v498_v32 = vadd.f32 %v478_v63, %v412_v62  ;;  %v564_v33 = vmul.f32 %v2226_v18, %v2848_v25  ;;  %v3011_v59 = vld [vmem:[%s2721_s29 + $0x88] sm:$0xff] }
  0x61   : > { %v414_v47 = vadd.f32 %v394_v2, %v328_v9  ;;  %v480_v27 = vmul.f32 %v2216_v16, %v2786_v37  ;;  %v585_v40 = vadd.f32 %v565_v41, %v499_v36  ;;  %v651_v8 = vmul.f32 %v2922_v46, %v2859_v43  ;;  %v2253_v63 = vld [vmem:[%s2721_s29 + $0x208] sm:$0xff] }
  0x62   : > { %v501_v6 = vadd.f32 %v481_v34, %v415_v17  ;;  %v567_v0 = vmul.f32 %v2229_v52, %v2806_v49  ;;  %v417_v51 = vadd.f32 %v397_v13, %v331_v21  ;;  %v483_v42 = vmul.f32 %v2217_v11, %v2829_v4  ;;  %v3008_v11 = vld [vmem:[%s2721_s29 + $0x38] sm:$0xff] }
  0x63   : > { %v330_v53 = vadd.f32 %v310_v3, %v244_v14  ;;  %v396_v9 = vmul.f32 %v2204_v44, %v2813_v54  ;;  %v752_v36 = vadd.f32 %v2913_v61, %v666_v56  ;;  %v669_v2 = vadd.f32 %v2944_v7, %v583_v5  ;;  %v4017_v14 = vld [vmem:[#allocation12_spill] sm:$0xff] }
  0x64   : > { %v737_v17 = vmul.f32 %v2925_v48, %v2869_v55  ;;  %v650_v46 = vmul.f32 %v2238_v22, %v2859_v43  ;;  %v668_v18 = vadd.f32 %v648_v35, %v582_v15  ;;  %v584_v26 = vadd.f32 %v564_v33, %v498_v32  ;;  %v2240_v48 = vld [vmem:[%s2721_s29 + $0x1b0] sm:$0xff]  ;;  %v3029_v32 = vld [vmem:[%s2721_s29 + $0xd8] sm:$0xff] }
  0x65   : > { %v500_v57 = vadd.f32 %v480_v27, %v414_v47  ;;  %v566_v58 = vmul.f32 %v2228_v23, %v2806_v49  ;;  %v671_v44 = vadd.f32 %v651_v8, %v585_v40  ;;  %v823_v61 = vmul.f32 %v2928_v50, %v2883_v20  ;;  %v2252_v27 = vld [vmem:[%s2721_s29 + $0x200] sm:$0xff]  ;;  %v2265_v40 = vld [vmem:[%s2721_s29 + $0x258] sm:$0xff] }
  0x66   : > { %v587_v62 = vadd.f32 %v567_v0, %v501_v6  ;;  %v653_v7 = vmul.f32 %v2241_v28, %v2833_v10  ;;  %v503_v22 = vadd.f32 %v483_v42, %v417_v51  ;;  %v569_v35 = vmul.f32 %v2229_v52, %v2848_v25  ;;  %v4020_v51 = vld [vmem:[#allocation19_spill] sm:$0xff] }
  0x67   : > { %v416_v41 = vadd.f32 %v396_v9, %v330_v53  ;;  %v482_v34 = vmul.f32 %v2216_v16, %v2829_v4  ;;  %v755_v21 = vadd.f32 %v2948_v1, %v669_v2  ;;  %v736_v13 = vmul.f32 %v2961_v24, %v2869_v55  ;;  %v4018_v16 = vld [vmem:[#allocation18_spill] sm:$0xff] }
  0x68   : > { %v247_v50 = vmul.f32 %v2745_v12, %v3008_v11  ;;  %v313_v3 = vmul.f32 %v3011_v59, %v4017_v14  ;;  %v754_v56 = vadd.f32 %v734_v30, %v668_v18  ;;  %v670_v5 = vadd.f32 %v650_v46, %v584_v26  ;;  %v3047_v2 = vld [vmem:[%s2721_s29 + $0x128] sm:$0xff]  ;;  %v2194_v26 = vld [vmem:[%s2721_s29 + $0x80] sm:$0xff] }
  0x69   : > { %v586_v15 = vadd.f32 %v566_v58, %v500_v57  ;;  %v652_v52 = vmul.f32 %v2240_v48, %v2833_v10  ;;  %v3032_v33 = vadd.f32 %v4018_v16, %v752_v36  ;;  %v757_v1 = vadd.f32 %v737_v17, %v671_v44  ;;  %v2264_v44 = vld [vmem:[%s2721_s29 + $0x250] sm:$0xff] }
  0x6a   : > { %v673_v47 = vadd.f32 %v653_v7, %v587_v62  ;;  %v739_v24 = vmul.f32 %v2253_v63, %v2843_v19  ;;  %v589_v8 = vadd.f32 %v569_v35, %v503_v22  ;;  %v655_v30 = vmul.f32 %v2241_v28, %v2859_v43 }
  0x6b   : > { %4019 = vst [vmem:[#allocation12_spill] sm:$0xff] %v3032_v33  ;;  %v502_v6 = vadd.f32 %v482_v34, %v416_v41  ;;  %v568_v0 = vmul.f32 %v2228_v23, %v2848_v25  ;;  %v3040_v42 = vadd.f32 %v4020_v51, %v755_v21  ;;  %v822_v53 = vmul.f32 %v2977_v60, %v2883_v20  ;;  %v220_v23 = vld [vmem:[%s2721_s29 + $0x30] sm:$0xff]  ;;  %v2231_v34 = vld [vmem:[%s2721_s29 + $0x178] sm:$0xff]  ;;  %v2243_v21 = vld [vmem:[%s2721_s29 + $0x1c8] sm:$0xff] }
  0x6c   : > { %v333_v9 = vadd.f32 %v313_v3, %v247_v50  ;;  %v399_v36 = vmul.f32 %v3029_v32, %v2771_v29  ;;  %v3049_v17 = vadd.f32 %v820_v31, %v754_v56  ;;  %v756_v28 = vadd.f32 %v736_v13, %v670_v5  ;;  %v3086_v51 = vld [vmem:[%s2721_s29 + $0x170] sm:$0xff] }
  0x6d   : > { %4021 = vst [vmem:[#allocation18_spill] sm:$0xff] %v3040_v42  ;;  %v672_v46 = vadd.f32 %v652_v52, %v586_v15  ;;  %v738_v18 = vmul.f32 %v2252_v27, %v2843_v19  ;;  %v3054_v57 = vadd.f32 %v823_v61, %v757_v1  ;;  %v759_v60 = vadd.f32 %v739_v24, %v673_v47  ;;  %v3077_v47 = vld [vmem:[%s2721_s29 + $0x218] sm:$0xff]  ;;  %v3080_v24 = vld [vmem:[%s2721_s29 + $0x268] sm:$0xff] }
  0x6e   : > { %4022 = vst [vmem:[#allocation19_spill] sm:$0xff] %v3049_v17  ;;  %v825_v58 = vmul.f32 %v2265_v40, %v2862_v45  ;;  %v741_v62 = vmul.f32 %v2253_v63, %v2869_v55  ;;  %v675_v31 = vadd.f32 %v655_v30, %v589_v8  ;;  %v588_v22 = vadd.f32 %v568_v0, %v502_v6  ;;  %v2206_v63 = vld [vmem:[%s2721_s29 + $0xd0] sm:$0xff]  ;;  %v2218_v0 = vld [vmem:[%s2721_s29 + $0x120] sm:$0xff] }
  0x6f   : > { %v654_v35 = vmul.f32 %v2240_v48, %v2859_v43  ;;  %v485_v41 = vmul.f32 %v3047_v2, %v2786_v37  ;;  %v419_v61 = vadd.f32 %v399_v36, %v333_v9  ;;  %v246_v13 = vmul.f32 %v2745_v12, %v220_v23  ;;  %v3092_v36 = vld [vmem:[%s2721_s29 + $0x210] sm:$0xff] }
  0x70   : > { %v312_v50 = vmul.f32 %v2194_v26, %v4017_v14  ;;  %v3067_v3 = vadd.f32 %v822_v53, %v756_v28  ;;  %v758_v48 = vadd.f32 %v738_v18, %v672_v46  ;;  %v824_v56 = vmul.f32 %v2264_v44, %v2862_v45  ;;  %v3089_v53 = vld [vmem:[%s2721_s29 + $0x1c0] sm:$0xff] }
  0x71   : > { %v827_v5 = vmul.f32 %v2265_v40, %v2883_v20  ;;  %v3071_v15 = vadd.f32 %v825_v58, %v759_v60  ;;  %v740_v52 = vmul.f32 %v2252_v27, %v2869_v55  ;;  %v826_v16 = vmul.f32 %v2264_v44, %v2883_v20  ;;  %v3095_v28 = vld [vmem:[%s2721_s29 + $0x260] sm:$0xff] }
  0x72   : > { %v571_v1 = vmul.f32 %v2231_v34, %v2806_v49  ;;  %v761_v8 = vadd.f32 %v741_v62, %v675_v31  ;;  %v674_v30 = vadd.f32 %v654_v35, %v588_v22  ;;  %v657_v6 = vmul.f32 %v2243_v21, %v2833_v10  ;;  %4024 = vst [vmem:[#allocation22_spill] sm:$0xff] %v3095_v28  ;;  %v223_v22 = vld [vmem:[%s2721_s29 + $0x48] sm:$0xff]  ;;  %v2197_v35 = vld [vmem:[%s2721_s29 + $0x98] sm:$0xff] }
  0x73   : > { %4023 = vst [vmem:[#allocation21_spill] sm:$0xff] %v3071_v15  ;;  %v398_v40 = vmul.f32 %v2206_v63, %v2771_v29  ;;  %v505_v27 = vadd.f32 %v485_v41, %v419_v61  ;;  %v332_v9 = vadd.f32 %v312_v50, %v246_v13  ;;  %v249_v46 = vmul.f32 %v2789_v38, %v3008_v11  ;;  %v222_v13 = vld [vmem:[%s2721_s29 + $0x40] sm:$0xff]  ;;  %v2196_v50 = vld [vmem:[%s2721_s29 + $0x90] sm:$0xff]  ;;  %v2221_v15 = vld [vmem:[%s2721_s29 + $0x138] sm:$0xff] }
  0x74   : > { %v315_v18 = vmul.f32 %v3011_v59, %v2792_v39  ;;  %v3101_v60 = vadd.f32 %v824_v56, %v758_v48  ;;  %v3105_v58 = vmul.f32 %v3077_v47, %v2843_v19  ;;  %v248_v44 = vmul.f32 %v2789_v38, %v220_v23 }
  0x75   : > { %v314_v62 = vmul.f32 %v2194_v26, %v2792_v39  ;;  %v484_v11 = vmul.f32 %v2218_v0, %v2786_v37  ;;  %v570_v59 = vmul.f32 %v3086_v51, %v2806_v49  ;;  %v3118_v31 = vmul.f32 %v3089_v53, %v2833_v10 }
  0x76   : > { %4025 = vst [vmem:[#allocation23_spill] sm:$0xff] %v3101_v60  ;;  %v3122_v41 = vadd.f32 %v827_v5, %v761_v8  ;;  %v760_v23 = vadd.f32 %v740_v52, %v674_v30  ;;  %v3126_v26 = vmul.f32 %v3092_v36, %v2843_v19  ;;  %v3130_v61 = vmul.f32 %v3095_v28, %v2862_v45  ;;  %v2208_v28 = vld [vmem:[%s2721_s29 + $0xe0] sm:$0xff] }
  0x77   : > { %v591_v48 = vadd.f32 %v571_v1, %v505_v27  ;;  %v418_v56 = vadd.f32 %v398_v40, %v332_v9  ;;  %v401_v5 = vmul.f32 %v3029_v32, %v2813_v54  ;;  %v334_v8 = vadd.f32 %v314_v62, %v248_v44  ;;  %v2209_v40 = vld [vmem:[%s2721_s29 + $0xe8] sm:$0xff]  ;;  %v4029_v9 = vld [vmem:[#allocation16_spill] sm:$0xff] }
  0x78   : > { %4027 = vst [vmem:[#allocation25_spill] sm:$0xff] %v3122_v41  ;;  %4028 = vst [vmem:[#allocation26_spill] sm:$0xff] %v3130_v61  ;;  %v400_v52 = vmul.f32 %v2206_v63, %v2813_v54  ;;  %v251_v30 = vmul.f32 %v2745_v12, %v223_v22  ;;  %v317_v41 = vmul.f32 %v2197_v35, %v4017_v14 }
  0x79   : > { %v573_v1 = vmul.f32 %v2231_v34, %v2848_v25  ;;  %v250_v27 = vmul.f32 %v2745_v12, %v222_v13  ;;  %v316_v32 = vmul.f32 %v2196_v50, %v4017_v14  ;;  %v3151_v44 = vadd.f32 %v826_v16, %v760_v23 }
  0x7a   : > { %v659_v62 = vmul.f32 %v2243_v21, %v2859_v43  ;;  %v504_v34 = vadd.f32 %v484_v11, %v418_v56  ;;  %v486_v12 = vmul.f32 %v2218_v0, %v2829_v4  ;;  %v420_v14 = vadd.f32 %v400_v52, %v334_v8  ;;  %v2220_v11 = vld [vmem:[%s2721_s29 + $0x130] sm:$0xff] }
  0x7b   : > { %v337_v60 = vadd.f32 %v317_v41, %v251_v30  ;;  %v336_v10 = vadd.f32 %v316_v32, %v250_v27  ;;  %v402_v16 = vmul.f32 %v2208_v28, %v2771_v29  ;;  %v253_v23 = vmul.f32 %v2789_v38, %v223_v22  ;;  %v2233_v30 = vld [vmem:[%s2721_s29 + $0x188] sm:$0xff] }
  0x7c   : > { %v319_v21 = vmul.f32 %v2197_v35, %v2792_v39  ;;  %v252_v41 = vmul.f32 %v2789_v38, %v222_v13  ;;  %v590_v56 = vadd.f32 %v570_v59, %v504_v34  ;;  %v572_v22 = vmul.f32 %v3086_v51, %v2848_v25  ;;  %v2232_v13 = vld [vmem:[%s2721_s29 + $0x180] sm:$0xff] }
  0x7d   : > { %v506_v35 = vadd.f32 %v486_v12, %v420_v14  ;;  %v489_v52 = vmul.f32 %v2221_v15, %v2786_v37  ;;  %v422_v27 = vadd.f32 %v402_v16, %v336_v10  ;;  %v488_v38 = vmul.f32 %v2220_v11, %v2786_v37 }
  0x7e   : > { %v831_v37 = vmul.f32 %v3080_v24, %v2883_v20  ;;  %v575_v32 = vmul.f32 %v2233_v30, %v2806_v49  ;;  %v490_v12 = vmul.f32 %v2220_v11, %v2829_v4 }
  0x7f   : > { %v508_v34 = vadd.f32 %v488_v38, %v422_v27  ;;  %v4037_v38 = vld [vmem:[#allocation22_spill] sm:$0xff] }
  0xc2   : > { %v857_v7 = vpop.xlane.xlu0 %856 }
  0xc3   : > { %2338 = vrcp.f32 %v857_v7  ;;  %v3111_v7 = vmul.f32 %v3080_v24, %v2862_v45  ;;  %v487_v45 = vmul.f32 %v3047_v2, %v2829_v4  ;;  %v677_v2 = vadd.f32 %v657_v6, %v591_v48  ;;  %v4031_v6 = vld [vmem:[#allocation20_spill] sm:$0xff] }
  0xc4   : > { %v318_v48 = vmul.f32 %v2196_v50, %v2792_v39  ;;  %v339_v39 = vadd.f32 %v319_v21, %v253_v23  ;;  %v658_v50 = vmul.f32 %v3089_v53, %v2859_v43  ;;  %v744_v23 = vmul.f32 %v3092_v36, %v2869_v55  ;;  %v4032_v21 = vld [vmem:[#allocation13_spill] sm:$0xff] }
  0xc5   : > { %4026 = vst [vmem:[#allocation24_spill] sm:$0xff] %v3111_v7  ;;  %v335_v7 = vadd.f32 %v315_v18, %v249_v46  ;;  %v4030_v46 = vld [vmem:[#allocation17_spill] sm:$0xff] }
  0xc6   : > { %v338_v59 = vadd.f32 %v318_v48, %v252_v41 }
  0xc7   : > { %v421_v61 = vadd.f32 %v401_v5, %v335_v7 }
  0xc9   : > { %v507_v5 = vadd.f32 %v487_v45, %v421_v61  ;;  %v405_v45 = vmul.f32 %v2209_v40, %v2813_v54  ;;  %v676_v61 = vadd.f32 %v3118_v31, %v590_v56  ;;  %v491_v31 = vmul.f32 %v2221_v15, %v2829_v4  ;;  %v2256_v4 = vld [vmem:[%s2721_s29 + $0x220] sm:$0xff] }
  0xcb   : > { %v593_v10 = vadd.f32 %v573_v1, %v507_v5  ;;  %v762_v14 = vadd.f32 %v3126_v26, %v676_v61  ;;  %v4033_v26 = vld [vmem:[#allocation21_spill] sm:$0xff] }
  0xcd   : > { %v3139_v19 = vpop.eup %2338  ;;  %v679_v16 = vadd.f32 %v659_v62, %v593_v10 }
  0xce   : > { %v860_v63 = vmul.f32 %v3139_v19, %v4029_v9  ;;  %v859_v18 = vmul.f32 %v3139_v19, %v4030_v46  ;;  %v403_v9 = vmul.f32 %v2209_v40, %v2771_v29  ;;  %v862_v7 = vmul.f32 %v3139_v19, %v4031_v6 }
  0xcf   : > { %v861_v0 = vmul.f32 %v3139_v19, %v3032_v33  ;;  %v745_v29 = vmul.f32 %v3077_v47, %v2869_v55  ;;  %v864_v47 = vmul.f32 %v3139_v19, %v3040_v42  ;;  %v863_v51 = vmul.f32 %v3139_v19, %v3049_v17 }
  0xd0   : > { %881 = vadd.xlane.f32.xlu1 %v860_v63  ;;  %879 = vadd.xlane.f32.xlu0 %v859_v18  ;;  %v423_v8 = vadd.f32 %v403_v9, %v337_v60  ;;  %v404_v60 = vmul.f32 %v2208_v28, %v2813_v54  ;;  %v592_v40 = vadd.f32 %v572_v22, %v506_v35  ;;  %v2245_v18 = vld [vmem:[%s2721_s29 + $0x1d8] sm:$0xff]  ;;  %v2244_v54 = vld [vmem:[%s2721_s29 + $0x1d0] sm:$0xff] }
  0xd1   : > { %v574_v9 = vmul.f32 %v2232_v13, %v2806_v49  ;;  %v425_v28 = vadd.f32 %v405_v45, %v339_v39  ;;  %v866_v24 = vmul.f32 %v3139_v19, %v3054_v57  ;;  %v865_v53 = vmul.f32 %v3139_v19, %v3067_v3  ;;  %v4035_v35 = vld [vmem:[#allocation24_spill] sm:$0xff] }
  0xd2   : > { %v509_v63 = vadd.f32 %v489_v52, %v423_v8  ;;  %v424_v1 = vadd.f32 %v404_v60, %v338_v59  ;;  %v763_v49 = vadd.f32 %v3105_v58, %v677_v2  ;;  %v678_v15 = vadd.f32 %v658_v50, %v592_v40  ;;  %v4034_v2 = vld [vmem:[#allocation23_spill] sm:$0xff]  ;;  %v4036_v52 = vld [vmem:[#allocation26_spill] sm:$0xff]  ;;  %v4039_v40 = vld [vmem:[#allocation25_spill] sm:$0xff] }
  0xd3   : > { %v660_v41 = vmul.f32 %v2244_v54, %v4032_v21  ;;  %v594_v56 = vadd.f32 %v574_v9, %v508_v34  ;;  %v511_v11 = vadd.f32 %v491_v31, %v425_v28  ;;  %v577_v58 = vmul.f32 %v2233_v30, %v2848_v25  ;;  %v4038_v30 = vld [vmem:[#allocation14_spill] sm:$0xff]  ;;  %v2269_v59 = vld [vmem:[%s2721_s29 + $0x278] sm:$0xff] }
  0xd4   : > { %885 = vadd.xlane.f32.xlu0 %v862_v7  ;;  %883 = vadd.xlane.f32.xlu1 %v861_v0  ;;  %v661_v7 = vmul.f32 %v2245_v18, %v4032_v21  ;;  %v2257_v0 = vld [vmem:[%s2721_s29 + $0x228] sm:$0xff]  ;;  %v595_v48 = vadd.f32 %v575_v32, %v509_v63  ;;  %v868_v62 = vmul.f32 %v3139_v19, %v4033_v26 }
  0xd5   : > { %v867_v36 = vmul.f32 %v3139_v19, %v4034_v2  ;;  %v510_v5 = vadd.f32 %v490_v12, %v424_v1  ;;  %v576_v22 = vmul.f32 %v2232_v13, %v2848_v25  ;;  %v3212_v8 = vadd.f32 %v4035_v35, %v763_v49  ;;  %v2268_v13 = vld [vmem:[%s2721_s29 + $0x270] sm:$0xff]  ;;  %s3851_s29 = scalar_lea.vmem [#allocation5], %s2279_s28 }
  0xd6   : > { %v3215_v27 = vadd.f32 %v4036_v52, %v762_v14  ;;  %v830_v39 = vmul.f32 %v4037_v38, %v2883_v20  ;;  %v747_v45 = vmul.f32 %v2257_v0, %v4038_v30  ;;  %v746_v60 = vmul.f32 %v2256_v4, %v4038_v30  ;;  %s2104_s23 = sshll.u32 %s3851_s29, 4  ;;  %s3919_s23 = int_to_ptr.vmem [resolvable:$true] %s2104_s23 }
  0xd7   : > { %v681_v61 = vadd.f32 %v661_v7, %v595_v48  ;;  %v680_v25 = vadd.f32 %v660_v41, %v594_v56  ;;  %v663_v10 = vmul.f32 %v2245_v18, %v2859_v43  ;;  %v662_v50 = vmul.f32 %v2244_v54, %v2859_v43  ;;  %s2540_s4 = scalar_lea.vmem %s3919_s23, 160  ;;  %p2547_p4 = scmp.lt.s32.totalorder %s3919_s23, %s2545_s6 }
  0xd8   : > { %889 = vadd.xlane.f32.xlu0 %v864_v47  ;;  %887 = vadd.xlane.f32.xlu1 %v863_v51  ;;  %v765_v47 = vadd.f32 %v745_v29, %v679_v16  ;;  %v764_v51 = vadd.f32 %v744_v23, %v678_v15  ;;  %v870_v32 = vmul.f32 %v3139_v19, %v4039_v40  ;;  %v4040_v29 = vld [vmem:[#allocation15_spill] sm:$0xff]  ;;  %p2541_p1 = scmp.ne.s32.totalorder %s3919_s23, %s2540_s4  ;;  %p2548_p5 = scmp.lt.s32.totalorder %s2546_s7, %s2540_s4 }
  0xd9   : > { %v869_v9 = vmul.f32 %v3139_v19, %v3151_v44  ;;  %v597_v63 = vadd.f32 %v577_v58, %v511_v11  ;;  %v596_v34 = vadd.f32 %v576_v22, %v510_v5  ;;  %v833_v28 = vmul.f32 %v2269_v59, %v4040_v29 }
  0xda   : > { %v3230_v31 = vadd.f32 %v831_v37, %v765_v47  ;;  %v832_v18 = vmul.f32 %v2268_v13, %v4040_v29  ;;  %v766_v43 = vadd.f32 %v746_v60, %v680_v25  ;;  %v749_v54 = vmul.f32 %v2257_v0, %v2869_v55  ;;  %p2542_p2 = pnand %p2541_p1, %p2682_p9  ;;  %p2549_p6 = por %p2548_p5, %p2547_p4 }
  0xdb   : > { %v748_v1 = vmul.f32 %v2256_v4, %v2869_v55  ;;  %v872_v12 = vmul.f32 %v3139_v19, %v3212_v8  ;;  %v871_v49 = vmul.f32 %v3139_v19, %v3215_v27  ;;  %v683_v14 = vadd.f32 %v663_v10, %v597_v63 }
  0xdc   : > { %893 = vadd.xlane.f32.xlu0 %v866_v24  ;;  %891 = vadd.xlane.f32.xlu1 %v865_v53  ;;  %v3232_v24 = vadd.f32 %v830_v39, %v764_v51  ;;  %v767_v53 = vadd.f32 %v747_v45, %v681_v61  ;;  %v682_v16 = vadd.f32 %v662_v50, %v596_v34  ;;  %p2543_p3 = pneg %p2542_p2 }
  0xdd   : > { %v3243_v23 = vadd.f32 %v832_v18, %v766_v43  ;;  %v835_v15 = vmul.f32 %v2269_v59, %v2883_v20  ;;  %v834_v21 = vmul.f32 %v2268_v13, %v2883_v20  ;;  %v874_v55 = vmul.f32 %v3139_v19, %v3230_v31 }
  0xde   : > { %v3241_v37 = vadd.f32 %v833_v28, %v767_v53  ;;  %v873_v7 = vmul.f32 %v3139_v19, %v3232_v24  ;;  %v769_v0 = vadd.f32 %v749_v54, %v683_v14  ;;  %v768_v41 = vadd.f32 %v748_v1, %v682_v16  ;;  %p2550_p7 = pnand %p2549_p6, %p2543_p3 }
  0xdf   : > { %v875_v56 = vmul.f32 %v3139_v19, %v3243_v23 }
  0xe0   : > { %897 = vadd.xlane.f32.xlu0 %v868_v62  ;;  %895 = vadd.xlane.f32.xlu1 %v867_v36  ;;  %v876_v48 = vmul.f32 %v3139_v19, %v3241_v37  ;;  %v3255_v4 = vadd.f32 %v835_v15, %v769_v0  ;;  %v3257_v11 = vadd.f32 %v834_v21, %v768_v41 }
  0xe2   : > { %4041 = vst [vmem:[#allocation13_spill] sm:$0xff] %v3255_v4  ;;  %4042 = vst [vmem:[#allocation21_spill] sm:$0xff] %v3257_v11  ;;  %v878_v20 = vmul.f32 %v3139_v19, %v3255_v4  ;;  %v877_v58 = vmul.f32 %v3139_v19, %v3257_v11 }
  0xe4   : > { %901 = vadd.xlane.f32.xlu0 %v870_v32  ;;  %899 = vadd.xlane.f32.xlu1 %v869_v9 }
  0xe8   : > { %905 = vadd.xlane.f32.xlu0 %v872_v12  ;;  %903 = vadd.xlane.f32.xlu1 %v871_v49 }
  0xec   : > { %909 = vadd.xlane.f32.xlu0 %v874_v55  ;;  %907 = vadd.xlane.f32.xlu1 %v873_v7 }
  0xf0   : > { %913 = vadd.xlane.f32.xlu0 %v876_v48  ;;  %911 = vadd.xlane.f32.xlu1 %v875_v56 }
  0xf4   : > { %917 = vadd.xlane.f32.xlu0 %v878_v20  ;;  %915 = vadd.xlane.f32.xlu1 %v877_v58 }
 0x15d   : > { %v3263_v62 = vpop.xlane.xlu1 %881  ;;  %v3265_v36 = vpop.xlane.xlu0 %879 }
 0x15e   : > { %v920_v5 = vmul.f32 %v3263_v62, %v3263_v62  ;;  %v919_v22 = vmul.f32 %v3265_v36, %v3265_v36 }
 0x160   : > { %v939_v35 = vadd.f32 %v920_v5, %v919_v22 }
 0x161   : > { %v3271_v52 = vpop.xlane.xlu0 %885  ;;  %v3273_v38 = vpop.xlane.xlu1 %883 }
 0x162   : > { %v940_v39 = vrot.slane %v939_v35, 4  ;;  %v922_v19 = vmul.f32 %v3271_v52, %v3271_v52  ;;  %v921_v30 = vmul.f32 %v3273_v38, %v3273_v38 }
 0x164   : > { %v941_v45 = vadd.f32 %v940_v39, %v939_v35  ;;  %v946_v47 = vadd.f32 %v922_v19, %v921_v30 }
 0x165   : > { %v3279_v51 = vpop.xlane.xlu0 %889  ;;  %v3281_v59 = vpop.xlane.xlu1 %887 }
 0x166   : > { %v942_v60 = vrot.slane %v941_v45, 2  ;;  %v947_v61 = vrot.slane %v946_v47, 4  ;;  %v924_v25 = vmul.f32 %v3279_v51, %v3279_v51  ;;  %v923_v13 = vmul.f32 %v3281_v59, %v3281_v59 }
 0x168   : > { %v943_v10 = vadd.f32 %v942_v60, %v941_v45  ;;  %v948_v50 = vadd.f32 %v947_v61, %v946_v47  ;;  %v953_v32 = vadd.f32 %v924_v25, %v923_v13 }
 0x169   : > { %v3287_v9 = vpop.xlane.xlu0 %893  ;;  %v3289_v63 = vpop.xlane.xlu1 %891 }
 0x16a   : > { %v944_v34 = vrot.slane %v943_v10, 1  ;;  %v949_v29 = vrot.slane %v948_v50, 2  ;;  %v954_v28 = vrot.slane %v953_v32, 4  ;;  %v926_v18 = vmul.f32 %v3287_v9, %v3287_v9 }
 0x16b   : > { %v925_v53 = vmul.f32 %v3289_v63, %v3289_v63 }
 0x16c   : > { %v945_v43 = vadd.f32 %v944_v34, %v943_v10  ;;  %v950_v54 = vadd.f32 %v949_v29, %v948_v50  ;;  %v955_v1 = vadd.f32 %v954_v28, %v953_v32 }
 0x16d   : > { %v960_v12 = vadd.f32 %v926_v18, %v925_v53  ;;  %v3295_v49 = vpop.xlane.xlu0 %897  ;;  %v3297_v14 = vpop.xlane.xlu1 %895 }
 0x16e   : > { %v1009_v16 = vadd.f32 1.0, %v945_v43  ;;  %v1059_v15 = vmax.f32 %v945_v43, 1e-30  ;;  %v951_v21 = vrot.slane %v950_v54, 1  ;;  %v956_v55 = vrot.slane %v955_v1, 2 }
 0x16f   : > { %v961_v7 = vrot.slane %v960_v12, 4  ;;  %v928_v0 = vmul.f32 %v3295_v49, %v3295_v49  ;;  %v927_v41 = vmul.f32 %v3297_v14, %v3297_v14 }
 0x170   : > { %2340 = vrcp.f32 %v1009_v16  ;;  %v952_v48 = vadd.f32 %v951_v21, %v950_v54  ;;  %v957_v56 = vadd.f32 %v956_v55, %v955_v1 }
 0x171   : > { %v962_v20 = vadd.f32 %v961_v7, %v960_v12  ;;  %v967_v58 = vadd.f32 %v928_v0, %v927_v41  ;;  %v3303_v5 = vpop.xlane.xlu0 %901  ;;  %v3305_v22 = vpop.xlane.xlu1 %899  ;;  %2342 = vrsqrt.f32 %v1059_v15 }
 0x172   : > { %v1010_v35 = vadd.f32 1.0, %v952_v48  ;;  %v958_v39 = vrot.slane %v957_v56, 1  ;;  %v930_v19 = vmul.f32 %v3303_v5, %v3303_v5  ;;  %v1060_v30 = vmax.f32 %v952_v48, 1e-30 }
 0x173   : > { %v963_v45 = vrot.slane %v962_v20, 2  ;;  %v968_v47 = vrot.slane %v967_v58, 4  ;;  %v929_v60 = vmul.f32 %v3305_v22, %v3305_v22 }
 0x174   : > { %2344 = vrcp.f32 %v1010_v35  ;;  %v3311_v61 = vadd.f32 %v958_v39, %v957_v56 }
 0x175   : > { %v964_v25 = vadd.f32 %v963_v45, %v962_v20  ;;  %v969_v13 = vadd.f32 %v968_v47, %v967_v58  ;;  %v974_v10 = vadd.f32 %v930_v19, %v929_v60  ;;  %v3313_v50 = vpop.xlane.xlu0 %905  ;;  %v3315_v32 = vpop.xlane.xlu1 %903  ;;  %2346 = vrsqrt.f32 %v1060_v30 }
 0x176   : > { %v1011_v34 = vadd.f32 1.0, %v3311_v61  ;;  %v932_v29 = vmul.f32 %v3313_v50, %v3313_v50  ;;  %v931_v28 = vmul.f32 %v3315_v32, %v3315_v32  ;;  %v1061_v1 = vmax.f32 %v3311_v61, 1e-30 }
 0x177   : > { %v965_v18 = vrot.slane %v964_v25, 1  ;;  %v970_v53 = vrot.slane %v969_v13, 2  ;;  %v975_v54 = vrot.slane %v974_v10, 4 }
 0x178   : > { %2348 = vrcp.f32 %v1011_v34  ;;  %v981_v12 = vadd.f32 %v932_v29, %v931_v28 }
 0x179   : > { %v3323_v16 = vadd.f32 %v965_v18, %v964_v25  ;;  %v971_v15 = vadd.f32 %v970_v53, %v969_v13  ;;  %v976_v21 = vadd.f32 %v975_v54, %v974_v10  ;;  %v3325_v55 = vpop.xlane.xlu0 %909  ;;  %v3327_v7 = vpop.xlane.xlu1 %907  ;;  %2350 = vrsqrt.f32 %v1061_v1 }
 0x17a   : > { %v2341_v0 = vpop.eup %2340  ;;  %v982_v41 = vrot.slane %v981_v12, 4  ;;  %v934_v56 = vmul.f32 %v3325_v55, %v3325_v55  ;;  %v933_v20 = vmul.f32 %v3327_v7, %v3327_v7 }
 0x17b   : > { %v1029_v58 = vmul.f32 %v2341_v0, %v945_v43  ;;  %v1012_v35 = vadd.f32 1.0, %v3323_v16  ;;  %v1062_v39 = vmax.f32 %v3323_v16, 1e-30  ;;  %v972_v19 = vrot.slane %v971_v15, 1  ;;  %v2343_v30 = vpop.eup %2342 }
 0x17c   : > { %v977_v45 = vrot.slane %v976_v21, 2  ;;  %v983_v47 = vadd.f32 %v982_v41, %v981_v12  ;;  %v988_v60 = vadd.f32 %v934_v56, %v933_v20 }
 0x17d   : > { %v1039_v25 = vmul.f32 %v1029_v58, %v3265_v36  ;;  %v1040_v13 = vmul.f32 %v1029_v58, %v3263_v62  ;;  %2352 = vrcp.f32 %v1012_v35  ;;  %v3337_v10 = vadd.f32 %v972_v19, %v971_v15  ;;  %v4043_v15 = vld [vmem:[#allocation16_spill] sm:$0xff] }
 0x17e   : > { %v2345_v34 = vpop.eup %2344  ;;  %2354 = vrsqrt.f32 %v1062_v39  ;;  %v978_v43 = vadd.f32 %v977_v45, %v976_v21  ;;  %v984_v29 = vrot.slane %v983_v47, 2  ;;  %v989_v28 = vrot.slane %v988_v60, 4  ;;  %v3349_v45 = vpop.xlane.xlu1 %911 }
 0x17f   : > { %v1079_v18 = vmul.f32 %v2343_v30, %v1039_v25  ;;  %v1080_v53 = vmul.f32 %v2343_v30, %v1040_v13  ;;  %v1030_v54 = vmul.f32 %v2345_v34, %v952_v48  ;;  %v1013_v1 = vadd.f32 1.0, %v3337_v10  ;;  %v2347_v56 = vpop.eup %2346  ;;  %v3347_v30 = vpop.xlane.xlu0 %913 }
 0x180   : > { %v1063_v12 = vmax.f32 %v3337_v10, 1e-30  ;;  %v979_v0 = vrot.slane %v978_v43, 1  ;;  %v985_v41 = vadd.f32 %v984_v29, %v983_v47  ;;  %v990_v36 = vadd.f32 %v989_v28, %v988_v60 }
 0x181   : > { %v1099_v62 = vmul.f32 %v1079_v18, %v4030_v46  ;;  %v1100_v20 = vmul.f32 %v1080_v53, %v4043_v15  ;;  %v1041_v58 = vmul.f32 %v1030_v54, %v3273_v38  ;;  %v1042_v21 = vmul.f32 %v1030_v54, %v3271_v52 }
 0x182   : > { %v2349_v35 = vpop.eup %2348  ;;  %2356 = vrcp.f32 %v1013_v1  ;;  %v3345_v39 = vadd.f32 %v979_v0, %v978_v43  ;;  %v986_v48 = vrot.slane %v985_v41, 1  ;;  %v991_v19 = vrot.slane %v990_v36, 2 }
 0x183   : > { %v1119_v47 = vadd.f32 %v1100_v20, %v1099_v62  ;;  %v1081_v60 = vmul.f32 %v2347_v56, %v1041_v58  ;;  %v1082_v25 = vmul.f32 %v2347_v56, %v1042_v21  ;;  %v1031_v13 = vmul.f32 %v2349_v35, %v3311_v61  ;;  %v2351_v53 = vpop.eup %2350  ;;  %v3367_v21 = vpop.xlane.xlu1 %915 }
 0x184   : > { %2358 = vrsqrt.f32 %v1063_v12  ;;  %v1014_v38 = vadd.f32 1.0, %v3345_v39  ;;  %v1064_v52 = vmax.f32 %v3345_v39, 1e-30  ;;  %v3354_v34 = vadd.f32 %v986_v48, %v985_v41 }
 0x185   : > { %v1101_v43 = vmul.f32 %v1081_v60, %v3032_v33  ;;  %v1102_v29 = vmul.f32 %v1082_v25, %v4031_v6  ;;  %v1043_v28 = vmul.f32 %v1031_v13, %v3281_v59  ;;  %v1044_v18 = vmul.f32 %v1031_v13, %v3279_v51  ;;  %v3365_v59 = vpop.xlane.xlu0 %917 }
 0x186   : > { %2360 = vrcp.f32 %v1014_v38  ;;  %v1015_v54 = vadd.f32 1.0, %v3354_v34  ;;  %v1065_v61 = vmax.f32 %v3354_v34, 1e-30  ;;  %v992_v1 = vadd.f32 %v991_v19, %v990_v36 }
 0x187   : > { %v2353_v12 = vpop.eup %2352  ;;  %v1126_v0 = vadd.f32 %v1102_v29, %v1101_v43  ;;  %v1083_v56 = vmul.f32 %v2351_v53, %v1043_v28  ;;  %v1084_v41 = vmul.f32 %v2351_v53, %v1044_v18  ;;  %2362 = vrsqrt.f32 %v1064_v52 }
 0x188   : > { %v2355_v62 = vpop.eup %2354  ;;  %v1032_v20 = vmul.f32 %v2353_v12, %v3323_v16  ;;  %2364 = vrcp.f32 %v1015_v54  ;;  %v993_v58 = vrot.slane %v992_v1, 1  ;;  %v936_v51 = vmul.f32 %v3347_v30, %v3347_v30 }
 0x189   : > { %v1127_v35 = vrot.slane %v1126_v0, 4  ;;  %v1103_v36 = vmul.f32 %v1083_v56, %v3049_v17  ;;  %v1104_v48 = vmul.f32 %v1084_v41, %v3040_v42  ;;  %2366 = vrsqrt.f32 %v1065_v61 }
 0x18a   : > { %v1045_v19 = vmul.f32 %v1032_v20, %v3289_v63  ;;  %v1046_v60 = vmul.f32 %v1032_v20, %v3287_v9  ;;  %v3373_v16 = vadd.f32 %v993_v58, %v992_v1  ;;  %v935_v25 = vmul.f32 %v3349_v45, %v3349_v45 }
 0x18b   : > { %v3377_v13 = vadd.f32 %v1104_v48, %v1103_v36  ;;  %v938_v38 = vmul.f32 %v3365_v59, %v3365_v59  ;;  %v937_v52 = vmul.f32 %v3367_v21, %v3367_v21  ;;  %v1120_v43 = vrot.slane %v1119_v47, 4 }
 0x18c   : > { %v2357_v29 = vpop.eup %2356  ;;  %v1085_v28 = vmul.f32 %v2355_v62, %v1045_v19  ;;  %v1086_v18 = vmul.f32 %v2355_v62, %v1046_v60  ;;  %v1016_v63 = vadd.f32 1.0, %v3373_v16  ;;  %v1066_v9 = vmax.f32 %v3373_v16, 1e-30 }
 0x18d   : > { %v1134_v53 = vrot.slane %v3377_v13, 4  ;;  %v1033_v54 = vmul.f32 %v2357_v29, %v3337_v10  ;;  %v995_v61 = vadd.f32 %v936_v51, %v935_v25  ;;  %v1002_v1 = vadd.f32 %v938_v38, %v937_v52 }
 0x18e   : > { %v2359_v12 = vpop.eup %2358  ;;  %v1105_v56 = vmul.f32 %v1085_v28, %v3067_v3  ;;  %v1106_v41 = vmul.f32 %v1086_v18, %v3054_v57  ;;  %2368 = vrcp.f32 %v1016_v63  ;;  %v1121_v20 = vadd.f32 %v1120_v43, %v1119_v47 }
 0x18f   : > { %v1047_v58 = vmul.f32 %v1033_v54, %v3297_v14  ;;  %v1048_v62 = vmul.f32 %v1033_v54, %v3295_v49  ;;  %2370 = vrsqrt.f32 %v1066_v9  ;;  %v996_v36 = vrot.slane %v995_v61, 4 }
 0x190   : > { %v2361_v48 = vpop.eup %2360  ;;  %v3391_v19 = vadd.f32 %v1106_v41, %v1105_v56  ;;  %v1003_v60 = vrot.slane %v1002_v1, 4  ;;  %v1122_v10 = vrot.slane %v1121_v20, 2  ;;  %v1128_v51 = vadd.f32 %v1127_v35, %v1126_v0 }
 0x191   : > { %v2363_v25 = vpop.eup %2362  ;;  %v1087_v38 = vmul.f32 %v2359_v12, %v1047_v58  ;;  %v1088_v52 = vmul.f32 %v2359_v12, %v1048_v62  ;;  %v1034_v29 = vmul.f32 %v2361_v48, %v3345_v39  ;;  %v997_v28 = vadd.f32 %v996_v36, %v995_v61 }
 0x192   : > { %v2365_v18 = vpop.eup %2364  ;;  %v1141_v47 = vrot.slane %v3391_v19, 4  ;;  %v1004_v14 = vadd.f32 %v1003_v60, %v1002_v1  ;;  %v1123_v43 = vadd.f32 %v1122_v10, %v1121_v20  ;;  %v1129_v49 = vrot.slane %v1128_v51, 2 }
 0x193   : > { %v2367_v63 = vpop.eup %2366  ;;  %v1107_v9 = vmul.f32 %v1087_v38, %v4034_v2  ;;  %v1108_v54 = vmul.f32 %v1088_v52, %v4033_v26  ;;  %v1049_v56 = vmul.f32 %v1034_v29, %v3305_v22  ;;  %v1050_v0 = vmul.f32 %v1034_v29, %v3303_v5 }
 0x194   : > { %v1035_v35 = vmul.f32 %v2365_v18, %v3354_v34  ;;  %v998_v12 = vrot.slane %v997_v28, 2  ;;  %v1005_v39 = vrot.slane %v1004_v14, 2  ;;  %v1124_v61 = vrot.slane %v1123_v43, 1 }
 0x195   : > { %v1147_v41 = vadd.f32 %v1108_v54, %v1107_v9  ;;  %v1089_v58 = vmul.f32 %v2363_v25, %v1049_v56  ;;  %v1090_v62 = vmul.f32 %v2363_v25, %v1050_v0  ;;  %v1130_v1 = vadd.f32 %v1129_v49, %v1128_v51 }
 0x196   : > { %v1051_v20 = vmul.f32 %v1035_v35, %v3315_v32  ;;  %v1052_v36 = vmul.f32 %v1035_v35, %v3313_v50  ;;  %v999_v48 = vadd.f32 %v998_v12, %v997_v28  ;;  %v1006_v60 = vadd.f32 %v1005_v39, %v1004_v14 }
 0x197   : > { %v1148_v10 = vrot.slane %v1147_v41, 4  ;;  %v1109_v22 = vmul.f32 %v1089_v58, %v3151_v44  ;;  %v1110_v5 = vmul.f32 %v1090_v62, %v4039_v40  ;;  %v3404_v38 = vadd.f32 %v1124_v61, %v1123_v43 }
 0x198   : > { %v2369_v34 = vpop.eup %2368  ;;  %v1091_v52 = vmul.f32 %v2367_v63, %v1051_v20  ;;  %v1092_v29 = vmul.f32 %v2367_v63, %v1052_v36  ;;  %v1000_v18 = vrot.slane %v999_v48, 1  ;;  %v1007_v9 = vrot.slane %v1006_v60, 1 }
 0x199   : > { %v2371_v25 = vpop.eup %2370  ;;  %v1154_v51 = vadd.f32 %v1110_v5, %v1109_v22  ;;  %v1036_v32 = vmul.f32 %v2369_v34, %v3373_v16  ;;  %1199 = vmax.xlane.f32.xlu1 %v3404_v38  ;;  %v1131_v50 = vrot.slane %v1130_v1, 1  ;;  %v1135_v28 = vadd.f32 %v1134_v53, %v3377_v13 }
 0x19a   : > { %v1111_v14 = vmul.f32 %v1091_v52, %v3215_v27  ;;  %v1112_v49 = vmul.f32 %v1092_v29, %v3212_v8  ;;  %v1001_v43 = vadd.f32 %v1000_v18, %v999_v48  ;;  %v1008_v54 = vadd.f32 %v1007_v9, %v1006_v60 }
 0x19b   : > { %v1053_v56 = vmul.f32 %v1036_v32, %v3327_v7  ;;  %v1054_v63 = vmul.f32 %v1036_v32, %v3325_v55  ;;  %v3413_v0 = vadd.f32 %v1131_v50, %v1130_v1  ;;  %v1155_v35 = vrot.slane %v1154_v51, 4 }
 0x19c   : > { %v1161_v12 = vadd.f32 %v1112_v49, %v1111_v14  ;;  %v1017_v16 = vadd.f32 1.0, %v1001_v43  ;;  %v1018_v39 = vadd.f32 1.0, %v1008_v54  ;;  %v1067_v62 = vmax.f32 %v1001_v43, 1e-30 }
 0x19d   : > { %v1093_v61 = vmul.f32 %v2371_v25, %v1053_v56  ;;  %v1094_v58 = vmul.f32 %v2371_v25, %v1054_v63  ;;  %1201 = vmax.xlane.f32.xlu0 %v3413_v0  ;;  %v1136_v13 = vrot.slane %v1135_v28, 2  ;;  %v1142_v20 = vadd.f32 %v1141_v47, %v3391_v19 }
 0x19e   : > { %v1162_v53 = vrot.slane %v1161_v12, 4  ;;  %2372 = vrcp.f32 %v1017_v16  ;;  %v1149_v36 = vadd.f32 %v1148_v10, %v1147_v41  ;;  %v1068_v1 = vmax.f32 %v1008_v54, 1e-30 }
 0x19f   : > { %v1113_v7 = vmul.f32 %v1093_v61, %v3232_v24  ;;  %v1114_v55 = vmul.f32 %v1094_v58, %v3230_v31  ;;  %v1137_v48 = vadd.f32 %v1136_v13, %v1135_v28  ;;  %2374 = vrcp.f32 %v1018_v39 }
 0x1a0   : > { %v1143_v60 = vrot.slane %v1142_v20, 2  ;;  %v1150_v22 = vrot.slane %v1149_v36, 2  ;;  %v1156_v5 = vadd.f32 %v1155_v35, %v1154_v51  ;;  %v1163_v29 = vadd.f32 %v1162_v53, %v1161_v12 }
 0x1a1   : > { %v1168_v34 = vadd.f32 %v1114_v55, %v1113_v7  ;;  %v1138_v52 = vrot.slane %v1137_v48, 1  ;;  %2376 = vrsqrt.f32 %v1067_v62 }
 0x1a2   : > { %v1144_v18 = vadd.f32 %v1143_v60, %v1142_v20  ;;  %v1151_v9 = vadd.f32 %v1150_v22, %v1149_v36  ;;  %v1157_v25 = vrot.slane %v1156_v5, 2  ;;  %v1164_v47 = vrot.slane %v1163_v29, 2 }
 0x1a3   : > { %v1169_v32 = vrot.slane %v1168_v34, 4  ;;  %v3419_v19 = vadd.f32 %v1138_v52, %v1137_v48  ;;  %2378 = vrsqrt.f32 %v1068_v1 }
 0x1a4   : > { %v1145_v41 = vrot.slane %v1144_v18, 1  ;;  %v1152_v10 = vrot.slane %v1151_v9, 1  ;;  %v1158_v50 = vadd.f32 %v1157_v25, %v1156_v5  ;;  %v1165_v28 = vadd.f32 %v1164_v47, %v1163_v29 }
 0x1a5   : > { %1203 = vmax.xlane.f32.xlu1 %v3419_v19  ;;  %v1170_v14 = vadd.f32 %v1169_v32, %v1168_v34 }
 0x1a6   : > { %v3422_v51 = vadd.f32 %v1145_v41, %v1144_v18  ;;  %v3424_v49 = vadd.f32 %v1152_v10, %v1151_v9  ;;  %v1159_v56 = vrot.slane %v1158_v50, 1  ;;  %v1166_v63 = vrot.slane %v1165_v28, 1 }
 0x1a7   : > { %v1171_v35 = vrot.slane %v1170_v14, 2 }
 0x1a8   : > { %v2373_v12 = vpop.eup %2372  ;;  %1205 = vmax.xlane.f32.xlu0 %v3422_v51  ;;  %v3427_v16 = vadd.f32 %v1159_v56, %v1158_v50  ;;  %v3430_v61 = vadd.f32 %v1166_v63, %v1165_v28 }
 0x1a9   : > { %v1037_v39 = vmul.f32 %v2373_v12, %v1001_v43  ;;  %1207 = vmax.xlane.f32.xlu1 %v3424_v49  ;;  %v1172_v58 = vadd.f32 %v1171_v35, %v1170_v14  ;;  %v2375_v62 = vpop.eup %2374 }
 0x1aa   : > { %4044 = vst [vmem:[#allocation23_spill] sm:$0xff] %v3427_v16  ;;  %4045 = vst [vmem:[#allocation24_spill] sm:$0xff] %v3430_v61  ;;  %v1038_v20 = vmul.f32 %v2375_v62, %v1008_v54 }
 0x1ab   : > { %v1055_v13 = vmul.f32 %v1037_v39, %v3349_v45  ;;  %v1056_v53 = vmul.f32 %v1037_v39, %v3347_v30  ;;  %v1173_v36 = vrot.slane %v1172_v58, 1  ;;  %v2377_v7 = vpop.eup %2376 }
 0x1ac   : > { %1209 = vmax.xlane.f32.xlu0 %v3427_v16  ;;  %v1057_v48 = vmul.f32 %v1038_v20, %v3367_v21  ;;  %v1058_v43 = vmul.f32 %v1038_v20, %v3365_v59 }
 0x1ad   : > { %v1095_v55 = vmul.f32 %v2377_v7, %v1055_v13  ;;  %v1096_v1 = vmul.f32 %v2377_v7, %v1056_v53  ;;  %1211 = vmax.xlane.f32.xlu1 %v3430_v61  ;;  %v2379_v60 = vpop.eup %2378  ;;  %v3438_v22 = vadd.f32 %v1173_v36, %v1172_v58 }
 0x1ae   : > { %v1097_v54 = vmul.f32 %v2379_v60, %v1057_v48  ;;  %v1098_v5 = vmul.f32 %v2379_v60, %v1058_v43 }
 0x1af   : > { %4046 = vst [vmem:[#allocation26_spill] sm:$0xff] %v3438_v22  ;;  %v1115_v45 = vmul.f32 %v1095_v55, %v3243_v23  ;;  %v1116_v30 = vmul.f32 %v1096_v1, %v3241_v37 }
 0x1b0   : > { %1213 = vmax.xlane.f32.xlu0 %v3438_v22  ;;  %v1117_v52 = vmul.f32 %v1097_v54, %v3257_v11  ;;  %v1118_v21 = vmul.f32 %v1098_v5, %v3255_v4 }
 0x1b1   : > { %v1175_v34 = vadd.f32 %v1116_v30, %v1115_v45 }
 0x1b2   : > { %v1182_v59 = vadd.f32 %v1118_v21, %v1117_v52 }
 0x1b3   : > { %v1176_v29 = vrot.slane %v1175_v34, 4 }
 0x1b4   : > { %v1183_v18 = vrot.slane %v1182_v59, 4 }
 0x1b5   : > { %v1177_v9 = vadd.f32 %v1176_v29, %v1175_v34 }
 0x1b6   : > { %v1184_v32 = vadd.f32 %v1183_v18, %v1182_v59 }
 0x1b7   : > { %v1178_v25 = vrot.slane %v1177_v9, 2 }
 0x1b8   : > { %v1185_v41 = vrot.slane %v1184_v32, 2 }
 0x1b9   : > { %v1179_v47 = vadd.f32 %v1178_v25, %v1177_v9 }
 0x1ba   : > { %v1186_v50 = vadd.f32 %v1185_v41, %v1184_v32 }
 0x1bb   : > { %v1180_v10 = vrot.slane %v1179_v47, 1 }
 0x1bc   : > { %v1187_v14 = vrot.slane %v1186_v50, 1 }
 0x1bd   : > { %v3445_v28 = vadd.f32 %v1180_v10, %v1179_v47 }
 0x1be   : > { %v3448_v56 = vadd.f32 %v1187_v14, %v1186_v50 }
 0x1bf   : > { %4047 = vst [vmem:[#allocation22_spill] sm:$0xff] %v3445_v28  ;;  %1215 = vmax.xlane.f32.xlu1 %v3445_v28 }
 0x1c0   : > { %4048 = vst [vmem:[#allocation14_spill] sm:$0xff] %v3448_v56  ;;  %1217 = vmax.xlane.f32.xlu0 %v3448_v56 }
 0x226   : > { %v1200_v63 = vpop.xlane.xlu1 %1199 }
 0x227   : > { %v1219_v35 = vsub.f32 %v3404_v38, %v1200_v63 }
 0x229   : > { %v1229_v12 = vmul.f32 1.442695, %v1219_v35 }
 0x22a   : > { %v1202_v39 = vpop.xlane.xlu0 %1201 }
 0x22b   : > { %2380 = vpow2.f32 %v1229_v12  ;;  %v1220_v58 = vsub.f32 %v3413_v0, %v1202_v39 }
 0x22d   : > { %v1231_v62 = vmul.f32 1.442695, %v1220_v58 }
 0x22f   : > { %2382 = vpow2.f32 %v1231_v62 }
 0x232   : > { %v1204_v13 = vpop.xlane.xlu1 %1203 }
 0x233   : > { %v1221_v53 = vsub.f32 %v3419_v19, %v1204_v13 }
 0x235   : > { %v2381_v20 = vpop.eup %2380  ;;  %v1233_v36 = vmul.f32 1.442695, %v1221_v53  ;;  %v1206_v7 = vpop.xlane.xlu0 %1205 }
 0x236   : > { %v1222_v55 = vsub.f32 %v3422_v51, %v1206_v7  ;;  %1249 = vadd.xlane.f32.xlu1 %v2381_v20  ;;  %v1208_v1 = vpop.xlane.xlu1 %1207 }
 0x237   : > { %2384 = vpow2.f32 %v1233_v36  ;;  %v1223_v48 = vsub.f32 %v3424_v49, %v1208_v1 }
 0x238   : > { %v1235_v43 = vmul.f32 1.442695, %v1222_v55 }
 0x239   : > { %v2383_v60 = vpop.eup %2382  ;;  %v1237_v45 = vmul.f32 1.442695, %v1223_v48  ;;  %v1210_v30 = vpop.xlane.xlu0 %1209 }
 0x23a   : > { %2386 = vpow2.f32 %v1235_v43  ;;  %v1224_v54 = vsub.f32 %v3427_v16, %v1210_v30  ;;  %1251 = vadd.xlane.f32.xlu0 %v2383_v60  ;;  %v1212_v5 = vpop.xlane.xlu1 %1211 }
 0x23b   : > { %2388 = vpow2.f32 %v1237_v45  ;;  %v1225_v34 = vsub.f32 %v3430_v61, %v1212_v5 }
 0x23c   : > { %v1239_v52 = vmul.f32 1.442695, %v1224_v54 }
 0x23d   : > { %v1241_v21 = vmul.f32 1.442695, %v1225_v34  ;;  %v1214_v29 = vpop.xlane.xlu0 %1213 }
 0x23e   : > { %2390 = vpow2.f32 %v1239_v52  ;;  %v1226_v59 = vsub.f32 %v3438_v22, %v1214_v29 }
 0x23f   : > { %2392 = vpow2.f32 %v1241_v21 }
 0x240   : > { %v1243_v18 = vmul.f32 1.442695, %v1226_v59 }
 0x241   : > { %v2385_v9 = vpop.eup %2384 }
 0x242   : > { %1253 = vadd.xlane.f32.xlu1 %v2385_v9  ;;  %2394 = vpow2.f32 %v1243_v18 }
 0x244   : > { %v2387_v25 = vpop.eup %2386 }
 0x245   : > { %v2389_v32 = vpop.eup %2388  ;;  %1255 = vadd.xlane.f32.xlu0 %v2387_v25 }
 0x246   : > { %1257 = vadd.xlane.f32.xlu1 %v2389_v32 }
 0x248   : > { %v3459_v47 = vpop.eup %2390 }
 0x249   : > { %v3461_v41 = vpop.eup %2392  ;;  %1259 = vadd.xlane.f32.xlu0 %v3459_v47 }
 0x24a   : > { %1261 = vadd.xlane.f32.xlu1 %v3461_v41 }
 0x24c   : > { %v3465_v10 = vpop.eup %2394  ;;  %v1216_v50 = vpop.xlane.xlu1 %1215 }
 0x24d   : > { %v1227_v14 = vsub.f32 %v3445_v28, %v1216_v50  ;;  %1263 = vadd.xlane.f32.xlu0 %v3465_v10  ;;  %v1218_v63 = vpop.xlane.xlu0 %1217 }
 0x24e   : > { %v1228_v12 = vsub.f32 %v3448_v56, %v1218_v63 }
 0x24f   : > { %v1245_v35 = vmul.f32 1.442695, %v1227_v14 }
 0x250   : > { %v1247_v39 = vmul.f32 1.442695, %v1228_v12 }
 0x251   : > { %2396 = vpow2.f32 %v1245_v35 }
 0x252   : > { %2398 = vpow2.f32 %v1247_v39 }
 0x25b   : > { %v3470_v58 = vpop.eup %2396 }
 0x25c   : > { %1265 = vadd.xlane.f32.xlu1 %v3470_v58  ;;  %v3473_v62 = vpop.eup %2398 }
 0x25d   : > { %1267 = vadd.xlane.f32.xlu0 %v3473_v62 }
 0x2c3   : > { %v1250_v13 = vpop.xlane.xlu1 %1249 }
 0x2c4   : > { %2400 = vrcp.f32 %v1250_v13 }
 0x2c7   : > { %v1252_v53 = vpop.xlane.xlu0 %1251 }
 0x2c8   : > { %2402 = vrcp.f32 %v1252_v53 }
 0x2ce   : > { %v2401_v36 = vpop.eup %2400 }
 0x2cf   : > { %v1254_v7 = vpop.xlane.xlu1 %1253  ;;  %v1279_v55 = vmul.f32 %v2401_v36, %v2381_v20 }
 0x2d0   : > { %2404 = vrcp.f32 %v1254_v7 }
 0x2d1   : > { %v1290_v1 = vmul.f32 %v1279_v55, %v4043_v15  ;;  %v1289_v48 = vmul.f32 %v1279_v55, %v4030_v46 }
 0x2d2   : > { %v2403_v43 = vpop.eup %2402  ;;  %v1256_v45 = vpop.xlane.xlu0 %1255 }
 0x2d3   : > { %2406 = vrcp.f32 %v1256_v45  ;;  %1311 = vadd.xlane.f32.xlu0 %v1290_v1  ;;  %1309 = vadd.xlane.f32.xlu1 %v1289_v48  ;;  %v1258_v30 = vpop.xlane.xlu1 %1257  ;;  %v1280_v54 = vmul.f32 %v2403_v43, %v2383_v60 }
 0x2d4   : > { %2408 = vrcp.f32 %v1258_v30 }
 0x2d5   : > { %v1292_v5 = vmul.f32 %v1280_v54, %v4031_v6  ;;  %v1291_v34 = vmul.f32 %v1280_v54, %v3032_v33 }
 0x2d6   : > { %v1260_v52 = vpop.xlane.xlu0 %1259 }
 0x2d7   : > { %2410 = vrcp.f32 %v1260_v52  ;;  %1315 = vadd.xlane.f32.xlu0 %v1292_v5  ;;  %1313 = vadd.xlane.f32.xlu1 %v1291_v34  ;;  %v1262_v20 = vpop.xlane.xlu1 %1261 }
 0x2d8   : > { %2412 = vrcp.f32 %v1262_v20 }
 0x2da   : > { %v2405_v21 = vpop.eup %2404  ;;  %v1264_v59 = vpop.xlane.xlu0 %1263 }
 0x2db   : > { %v1281_v29 = vmul.f32 %v2405_v21, %v2385_v9  ;;  %2414 = vrcp.f32 %v1264_v59 }
 0x2dd   : > { %v2407_v18 = vpop.eup %2406  ;;  %v1294_v50 = vmul.f32 %v1281_v29, %v3040_v42  ;;  %v1293_v14 = vmul.f32 %v1281_v29, %v3049_v17 }
 0x2de   : > { %v2409_v60 = vpop.eup %2408  ;;  %v1282_v63 = vmul.f32 %v2407_v18, %v2387_v25 }
 0x2df   : > { %1319 = vadd.xlane.f32.xlu0 %v1294_v50  ;;  %1317 = vadd.xlane.f32.xlu1 %v1293_v14  ;;  %v1283_v35 = vmul.f32 %v2409_v60, %v2389_v32 }
 0x2e0   : > { %v1296_v12 = vmul.f32 %v1282_v63, %v3054_v57  ;;  %v1295_v39 = vmul.f32 %v1282_v63, %v3067_v3 }
 0x2e1   : > { %v2411_v13 = vpop.eup %2410  ;;  %v1298_v9 = vmul.f32 %v1283_v35, %v4033_v26  ;;  %v1297_v53 = vmul.f32 %v1283_v35, %v4034_v2 }
 0x2e2   : > { %v1284_v36 = vmul.f32 %v2411_v13, %v3459_v47  ;;  %v2413_v7 = vpop.eup %2412 }
 0x2e3   : > { %1323 = vadd.xlane.f32.xlu0 %v1296_v12  ;;  %1321 = vadd.xlane.f32.xlu1 %v1295_v39  ;;  %v1285_v55 = vmul.f32 %v2413_v7, %v3461_v41 }
 0x2e4   : > { %v1300_v25 = vmul.f32 %v1284_v36, %v4039_v40  ;;  %v1299_v32 = vmul.f32 %v1284_v36, %v3151_v44 }
 0x2e5   : > { %v2415_v1 = vpop.eup %2414  ;;  %v1302_v45 = vmul.f32 %v1285_v55, %v3212_v8  ;;  %v1301_v30 = vmul.f32 %v1285_v55, %v3215_v27 }
 0x2e6   : > { %v1286_v47 = vmul.f32 %v2415_v1, %v3465_v10 }
 0x2e7   : > { %1327 = vadd.xlane.f32.xlu0 %v1298_v9  ;;  %1325 = vadd.xlane.f32.xlu1 %v1297_v53 }
 0x2e8   : > { %v1304_v54 = vmul.f32 %v1286_v47, %v3230_v31  ;;  %v1303_v5 = vmul.f32 %v1286_v47, %v3232_v24 }
 0x2e9   : > { %v1266_v48 = vpop.xlane.xlu1 %1265 }
 0x2ea   : > { %2416 = vrcp.f32 %v1266_v48  ;;  %v1268_v43 = vpop.xlane.xlu0 %1267 }
 0x2eb   : > { %1331 = vadd.xlane.f32.xlu0 %v1300_v25  ;;  %1329 = vadd.xlane.f32.xlu1 %v1299_v32  ;;  %2418 = vrcp.f32 %v1268_v43 }
 0x2ef   : > { %1335 = vadd.xlane.f32.xlu0 %v1302_v45  ;;  %1333 = vadd.xlane.f32.xlu1 %v1301_v30 }
 0x2f3   : > { %1339 = vadd.xlane.f32.xlu0 %v1304_v54  ;;  %1337 = vadd.xlane.f32.xlu1 %v1303_v5 }
 0x2f4   : > { %v2417_v41 = vpop.eup %2416 }
 0x2f5   : > { %v1287_v34 = vmul.f32 %v2417_v41, %v3470_v58  ;;  %v2419_v52 = vpop.eup %2418 }
 0x2f6   : > { %v1288_v29 = vmul.f32 %v2419_v52, %v3473_v62 }
 0x2f7   : > { %v1306_v20 = vmul.f32 %v1287_v34, %v3241_v37  ;;  %v1305_v21 = vmul.f32 %v1287_v34, %v3243_v23 }
 0x2f8   : > { %v1308_v10 = vmul.f32 %v1288_v29, %v3255_v4  ;;  %v1307_v59 = vmul.f32 %v1288_v29, %v3257_v11 }
 0x2f9   : > { %1343 = vadd.xlane.f32.xlu0 %v1306_v20  ;;  %1341 = vadd.xlane.f32.xlu1 %v1305_v21 }
 0x2fd   : > { %1347 = vadd.xlane.f32.xlu0 %v1308_v10  ;;  %1345 = vadd.xlane.f32.xlu1 %v1307_v59 }
 0x360   : > { %v3501_v18 = vpop.xlane.xlu0 %1311  ;;  %v3503_v50 = vpop.xlane.xlu1 %1309 }
 0x361   : > { %v1350_v58 = vmul.f32 %v3501_v18, %v3501_v18  ;;  %v1349_v14 = vmul.f32 %v3503_v50, %v3503_v50 }
 0x363   : > { %v1369_v60 = vadd.f32 %v1350_v58, %v1349_v14 }
 0x364   : > { %v3509_v62 = vpop.xlane.xlu0 %1315  ;;  %v3511_v63 = vpop.xlane.xlu1 %1313 }
 0x365   : > { %v1370_v35 = vrot.slane %v1369_v60, 4  ;;  %v1352_v12 = vmul.f32 %v3509_v62, %v3509_v62  ;;  %v1351_v39 = vmul.f32 %v3511_v63, %v3511_v63 }
 0x367   : > { %v1371_v13 = vadd.f32 %v1370_v35, %v1369_v60  ;;  %v1376_v9 = vadd.f32 %v1352_v12, %v1351_v39 }
 0x369   : > { %v1372_v53 = vrot.slane %v1371_v13, 2  ;;  %v1377_v36 = vrot.slane %v1376_v9, 4 }
 0x36b   : > { %v1373_v7 = vadd.f32 %v1372_v53, %v1371_v13  ;;  %v1378_v25 = vadd.f32 %v1377_v36, %v1376_v9 }
 0x36c   : > { %v3517_v32 = vpop.xlane.xlu0 %1319  ;;  %v3519_v55 = vpop.xlane.xlu1 %1317 }
 0x36d   : > { %v1374_v1 = vrot.slane %v1373_v7, 1  ;;  %v1379_v48 = vrot.slane %v1378_v25, 2  ;;  %v1354_v43 = vmul.f32 %v3517_v32, %v3517_v32  ;;  %v1353_v45 = vmul.f32 %v3519_v55, %v3519_v55 }
 0x36f   : > { %v1375_v30 = vadd.f32 %v1374_v1, %v1373_v7  ;;  %v1380_v47 = vadd.f32 %v1379_v48, %v1378_v25  ;;  %v1383_v54 = vadd.f32 %v1354_v43, %v1353_v45 }
 0x370   : > { %v3525_v5 = vpop.xlane.xlu0 %1323  ;;  %v3527_v41 = vpop.xlane.xlu1 %1321 }
 0x371   : > { %v1439_v34 = vadd.f32 1.0, %v1375_v30  ;;  %v1381_v52 = vrot.slane %v1380_v47, 1  ;;  %v1384_v20 = vrot.slane %v1383_v54, 4  ;;  %v1489_v21 = vmax.f32 %v1375_v30, 1e-30 }
 0x372   : > { %v1356_v29 = vmul.f32 %v3525_v5, %v3525_v5  ;;  %v1355_v10 = vmul.f32 %v3527_v41, %v3527_v41 }
 0x373   : > { %2420 = vrcp.f32 %v1439_v34  ;;  %v1382_v59 = vadd.f32 %v1381_v52, %v1380_v47  ;;  %v1385_v58 = vadd.f32 %v1384_v20, %v1383_v54 }
 0x374   : > { %v1390_v14 = vadd.f32 %v1356_v29, %v1355_v10  ;;  %v3533_v60 = vpop.xlane.xlu0 %1327  ;;  %v3535_v35 = vpop.xlane.xlu1 %1325  ;;  %2422 = vrsqrt.f32 %v1489_v21 }
 0x375   : > { %v1440_v12 = vadd.f32 1.0, %v1382_v59  ;;  %v1386_v39 = vrot.slane %v1385_v58, 2  ;;  %v1358_v13 = vmul.f32 %v3533_v60, %v3533_v60  ;;  %v1357_v53 = vmul.f32 %v3535_v35, %v3535_v35 }
 0x376   : > { %v1391_v9 = vrot.slane %v1390_v14, 4  ;;  %v1490_v36 = vmax.f32 %v1382_v59, 1e-30 }
 0x377   : > { %2424 = vrcp.f32 %v1440_v12  ;;  %v1387_v7 = vadd.f32 %v1386_v39, %v1385_v58  ;;  %v1397_v1 = vadd.f32 %v1358_v13, %v1357_v53 }
 0x378   : > { %v1392_v25 = vadd.f32 %v1391_v9, %v1390_v14  ;;  %v3541_v48 = vpop.xlane.xlu0 %1331  ;;  %v3543_v43 = vpop.xlane.xlu1 %1329  ;;  %2426 = vrsqrt.f32 %v1490_v36 }
 0x379   : > { %v1388_v45 = vrot.slane %v1387_v7, 1  ;;  %v1360_v47 = vmul.f32 %v3541_v48, %v3541_v48  ;;  %v1359_v54 = vmul.f32 %v3543_v43, %v3543_v43  ;;  %v1398_v52 = vrot.slane %v1397_v1, 4 }
 0x37a   : > { %v1393_v34 = vrot.slane %v1392_v25, 2 }
 0x37b   : > { %v3549_v20 = vadd.f32 %v1388_v45, %v1387_v7  ;;  %v1404_v21 = vadd.f32 %v1360_v47, %v1359_v54  ;;  %v1399_v10 = vadd.f32 %v1398_v52, %v1397_v1 }
 0x37c   : > { %v1394_v29 = vadd.f32 %v1393_v34, %v1392_v25  ;;  %v3551_v58 = vpop.xlane.xlu0 %1335  ;;  %v3553_v14 = vpop.xlane.xlu1 %1333 }
 0x37d   : > { %v2421_v12 = vpop.eup %2420  ;;  %v1441_v39 = vadd.f32 1.0, %v3549_v20  ;;  %v1491_v13 = vmax.f32 %v3549_v20, 1e-30  ;;  %v1405_v9 = vrot.slane %v1404_v21, 4  ;;  %v1362_v53 = vmul.f32 %v3551_v58, %v3551_v58 }
 0x37e   : > { %v1459_v56 = vmul.f32 %v2421_v12, %v1375_v30  ;;  %v1395_v36 = vrot.slane %v1394_v29, 1  ;;  %v1400_v7 = vrot.slane %v1399_v10, 2  ;;  %v1361_v25 = vmul.f32 %v3553_v14, %v3553_v14  ;;  %v2423_v45 = vpop.eup %2422 }
 0x37f   : > { %2428 = vrcp.f32 %v1441_v39  ;;  %v1406_v1 = vadd.f32 %v1405_v9, %v1404_v21 }
 0x380   : > { %v1469_v47 = vmul.f32 %v1459_v56, %v3503_v50  ;;  %v1470_v54 = vmul.f32 %v1459_v56, %v3501_v18  ;;  %v3563_v34 = vadd.f32 %v1395_v36, %v1394_v29  ;;  %v3565_v52 = vpop.xlane.xlu0 %1339  ;;  %v3567_v28 = vpop.xlane.xlu1 %1337  ;;  %2430 = vrsqrt.f32 %v1491_v13 }
 0x381   : > { %v2425_v22 = vpop.eup %2424  ;;  %v1401_v30 = vadd.f32 %v1400_v7, %v1399_v10  ;;  %v1407_v12 = vrot.slane %v1406_v1, 2  ;;  %v1411_v61 = vadd.f32 %v1362_v53, %v1361_v25 }
 0x382   : > { %v1509_v4 = vmul.f32 %v2423_v45, %v1469_v47  ;;  %v1510_v11 = vmul.f32 %v2423_v45, %v1470_v54  ;;  %v1460_v39 = vmul.f32 %v2425_v22, %v1382_v59  ;;  %v1442_v21 = vadd.f32 1.0, %v3563_v34  ;;  %v2427_v13 = vpop.eup %2426 }
 0x383   : > { %v1492_v50 = vmax.f32 %v3563_v34, 1e-30  ;;  %v1402_v9 = vrot.slane %v1401_v30, 1  ;;  %v1408_v56 = vadd.f32 %v1407_v12, %v1406_v1  ;;  %v1412_v18 = vrot.slane %v1411_v61, 4 }
 0x384   : > { %v1529_v29 = vmul.f32 %v1509_v4, %v4030_v46  ;;  %v1530_v36 = vmul.f32 %v1510_v11, %v4043_v15  ;;  %v1471_v16 = vmul.f32 %v1460_v39, %v3511_v63  ;;  %v1472_v10 = vmul.f32 %v1460_v39, %v3509_v62 }
 0x385   : > { %2432 = vrcp.f32 %v1442_v21  ;;  %v3575_v53 = vadd.f32 %v1402_v9, %v1401_v30  ;;  %v1409_v22 = vrot.slane %v1408_v56, 1  ;;  %v1413_v59 = vadd.f32 %v1412_v18, %v1411_v61 }
 0x386   : > { %v1549_v7 = vadd.f32 %v1530_v36, %v1529_v29  ;;  %v1511_v25 = vmul.f32 %v2427_v13, %v1471_v16  ;;  %v1512_v45 = vmul.f32 %v2427_v13, %v1472_v10  ;;  %v1364_v1 = vmul.f32 %v3565_v52, %v3565_v52  ;;  %v3579_v47 = vpop.xlane.xlu0 %1343  ;;  %v3581_v4 = vpop.xlane.xlu1 %1341 }
 0x387   : > { %2434 = vrsqrt.f32 %v1492_v50  ;;  %v1443_v11 = vadd.f32 1.0, %v3575_v53  ;;  %v3584_v62 = vadd.f32 %v1409_v22, %v1408_v56  ;;  %v1414_v63 = vrot.slane %v1413_v59, 2 }
 0x388   : > { %v1531_v54 = vmul.f32 %v1511_v25, %v3032_v33  ;;  %v1532_v61 = vmul.f32 %v1512_v45, %v4031_v6  ;;  %v1493_v16 = vmax.f32 %v3575_v53, 1e-30  ;;  %v1363_v30 = vmul.f32 %v3567_v28, %v3567_v28 }
 0x389   : > { %v2429_v12 = vpop.eup %2428  ;;  %2436 = vrcp.f32 %v1443_v11  ;;  %v1444_v39 = vadd.f32 1.0, %v3584_v62  ;;  %v1415_v21 = vadd.f32 %v1414_v63, %v1413_v59  ;;  %v1366_v50 = vmul.f32 %v3579_v47, %v3579_v47 }
 0x38a   : > { %v1556_v9 = vadd.f32 %v1532_v61, %v1531_v54  ;;  %v1461_v56 = vmul.f32 %v2429_v12, %v3549_v20  ;;  %v1494_v18 = vmax.f32 %v3584_v62, 1e-30  ;;  %v1418_v29 = vadd.f32 %v1364_v1, %v1363_v30  ;;  %v3596_v36 = vpop.xlane.xlu0 %1347  ;;  %v3598_v10 = vpop.xlane.xlu1 %1345 }
 0x38b   : > { %v2431_v13 = vpop.eup %2430  ;;  %2438 = vrcp.f32 %v1444_v39  ;;  %v1416_v22 = vrot.slane %v1415_v21, 1  ;;  %v1365_v25 = vmul.f32 %v3581_v4, %v3581_v4  ;;  %v1368_v59 = vmul.f32 %v3596_v36, %v3596_v36 }
 0x38c   : > { %v1473_v45 = vmul.f32 %v1461_v56, %v3519_v55  ;;  %v1474_v20 = vmul.f32 %v1461_v56, %v3517_v32  ;;  %2440 = vrsqrt.f32 %v1493_v16  ;;  %v1419_v11 = vrot.slane %v1418_v29, 4 }
 0x38d   : > { %v3606_v1 = vadd.f32 %v1416_v22, %v1415_v21  ;;  %v1425_v63 = vadd.f32 %v1366_v50, %v1365_v25  ;;  %v1367_v54 = vmul.f32 %v3598_v10, %v3598_v10  ;;  %v1550_v61 = vrot.slane %v1549_v7, 4 }
 0x38e   : > { %v1513_v30 = vmul.f32 %v2431_v13, %v1473_v45  ;;  %v1514_v12 = vmul.f32 %v2431_v13, %v1474_v20  ;;  %2442 = vrsqrt.f32 %v1494_v18  ;;  %v1420_v39 = vadd.f32 %v1419_v11, %v1418_v29 }
 0x38f   : > { %v2433_v33 = vpop.eup %2432  ;;  %v1445_v6 = vadd.f32 1.0, %v3606_v1  ;;  %v1495_v55 = vmax.f32 %v3606_v1, 1e-30  ;;  %v1426_v46 = vrot.slane %v1425_v63, 4  ;;  %v1432_v32 = vadd.f32 %v1368_v59, %v1367_v54 }
 0x390   : > { %v1533_v16 = vmul.f32 %v1513_v30, %v3049_v17  ;;  %v1534_v21 = vmul.f32 %v1514_v12, %v3040_v42  ;;  %v1462_v50 = vmul.f32 %v2433_v33, %v3563_v34  ;;  %v1421_v56 = vrot.slane %v1420_v39, 2 }
 0x391   : > { %v2435_v22 = vpop.eup %2434  ;;  %2444 = vrcp.f32 %v1445_v6  ;;  %v1427_v25 = vadd.f32 %v1426_v46, %v1425_v63  ;;  %v1433_v13 = vrot.slane %v1432_v32, 4  ;;  %v1551_v18 = vadd.f32 %v1550_v61, %v1549_v7 }
 0x392   : > { %v3615_v29 = vadd.f32 %v1534_v21, %v1533_v16  ;;  %v1475_v45 = vmul.f32 %v1462_v50, %v3527_v41  ;;  %v1476_v20 = vmul.f32 %v1462_v50, %v3525_v5  ;;  %v1557_v11 = vrot.slane %v1556_v9, 4 }
 0x393   : > { %v2437_v59 = vpop.eup %2436  ;;  %v1422_v54 = vadd.f32 %v1421_v56, %v1420_v39  ;;  %v1428_v30 = vrot.slane %v1427_v25, 2  ;;  %v1434_v17 = vadd.f32 %v1433_v13, %v1432_v32  ;;  %v1552_v12 = vrot.slane %v1551_v18, 2 }
 0x394   : > { %v1515_v42 = vmul.f32 %v2435_v22, %v1475_v45  ;;  %v1516_v33 = vmul.f32 %v2435_v22, %v1476_v20  ;;  %v1463_v34 = vmul.f32 %v2437_v59, %v3575_v53  ;;  %2446 = vrsqrt.f32 %v1495_v55 }
 0x395   : > { %v2439_v46 = vpop.eup %2438  ;;  %v1423_v6 = vrot.slane %v1422_v54, 1  ;;  %v1429_v7 = vadd.f32 %v1428_v30, %v1427_v25  ;;  %v1435_v63 = vrot.slane %v1434_v17, 2  ;;  %v1553_v61 = vadd.f32 %v1552_v12, %v1551_v18 }
 0x396   : > { %v2441_v16 = vpop.eup %2440  ;;  %v1535_v41 = vmul.f32 %v1515_v42, %v3067_v3  ;;  %v1477_v5 = vmul.f32 %v1463_v34, %v3535_v35  ;;  %v1478_v39 = vmul.f32 %v1463_v34, %v3533_v60  ;;  %v1558_v21 = vadd.f32 %v1557_v11, %v1556_v9 }
 0x397   : > { %v1464_v32 = vmul.f32 %v2439_v46, %v3584_v62  ;;  %v3624_v50 = vadd.f32 %v1423_v6, %v1422_v54  ;;  %v1430_v56 = vrot.slane %v1429_v7, 1  ;;  %v1436_v53 = vadd.f32 %v1435_v63, %v1434_v17 }
 0x398   : > { %v2443_v55 = vpop.eup %2442  ;;  %v1536_v22 = vmul.f32 %v1516_v33, %v3054_v57  ;;  %v1517_v25 = vmul.f32 %v2441_v16, %v1477_v5  ;;  %v1518_v13 = vmul.f32 %v2441_v16, %v1478_v39  ;;  %v1554_v18 = vrot.slane %v1553_v61, 1 }
 0x399   : > { %v1479_v45 = vmul.f32 %v1464_v32, %v3543_v43  ;;  %v1480_v42 = vmul.f32 %v1464_v32, %v3541_v48  ;;  %v1446_v35 = vadd.f32 1.0, %v3624_v50  ;;  %v1496_v60 = vmax.f32 %v3624_v50, 1e-30 }
 0x39a   : > { %v1537_v62 = vmul.f32 %v1517_v25, %v4034_v2  ;;  %v1538_v9 = vmul.f32 %v1518_v13, %v4033_v26  ;;  %v1431_v20 = vadd.f32 %v1430_v56, %v1429_v7  ;;  %v1437_v17 = vrot.slane %v1436_v53, 1 }
 0x39b   : > { %v2445_v11 = vpop.eup %2444  ;;  %v1519_v59 = vmul.f32 %v2443_v55, %v1479_v45  ;;  %v1520_v54 = vmul.f32 %v2443_v55, %v1480_v42  ;;  %2448 = vrcp.f32 %v1446_v35  ;;  %v1555_v30 = vadd.f32 %v1554_v18, %v1553_v61 }
 0x39c   : > { %v1570_v12 = vadd.f32 %v1536_v22, %v1535_v41  ;;  %v1577_v33 = vadd.f32 %v1538_v9, %v1537_v62  ;;  %v1465_v43 = vmul.f32 %v2445_v11, %v3606_v1  ;;  %v1447_v48 = vadd.f32 1.0, %v1431_v20 }
 0x39d   : > { %v1539_v34 = vmul.f32 %v1519_v59, %v3151_v44  ;;  %v1540_v46 = vmul.f32 %v1520_v54, %v4039_v40  ;;  %v1497_v6 = vmax.f32 %v1431_v20, 1e-30  ;;  %v3636_v63 = vadd.f32 %v1437_v17, %v1436_v53 }
 0x39e   : > { %v2447_v16 = vpop.eup %2446  ;;  %v1481_v7 = vmul.f32 %v1465_v43, %v3553_v14  ;;  %v1482_v5 = vmul.f32 %v1465_v43, %v3551_v58  ;;  %2450 = vrcp.f32 %v1447_v48  ;;  %v3641_v61 = vadd.f32 %v1555_v30, %v3404_v38 }
 0x39f   : > { %v1584_v41 = vadd.f32 %v1540_v46, %v1539_v34  ;;  %2452 = vrsqrt.f32 %v1496_v60  ;;  %v1448_v1 = vadd.f32 1.0, %v3636_v63  ;;  %v1498_v39 = vmax.f32 %v3636_v63, 1e-30 }
 0x3a0   : > { %v1521_v32 = vmul.f32 %v2447_v16, %v1481_v7  ;;  %v1522_v56 = vmul.f32 %v2447_v16, %v1482_v5  ;;  %1629 = vmax.xlane.f32.xlu1 %v3641_v61  ;;  %v1559_v53 = vrot.slane %v1558_v21, 2  ;;  %v1564_v55 = vrot.slane %v3615_v29, 4 }
 0x3a1   : > { %2454 = vrcp.f32 %v1448_v1  ;;  %v1571_v14 = vrot.slane %v1570_v12, 4  ;;  %v1578_v58 = vrot.slane %v1577_v33, 4  ;;  %v1585_v22 = vrot.slane %v1584_v41, 4 }
 0x3a2   : > { %v1541_v38 = vmul.f32 %v1521_v32, %v3215_v27  ;;  %v1542_v25 = vmul.f32 %v1522_v56, %v3212_v8  ;;  %2456 = vrsqrt.f32 %v1497_v6  ;;  %v1560_v13 = vadd.f32 %v1559_v53, %v1558_v21 }
 0x3a3   : > { %v1565_v18 = vadd.f32 %v1564_v55, %v3615_v29  ;;  %v1572_v45 = vadd.f32 %v1571_v14, %v1570_v12  ;;  %v1579_v42 = vadd.f32 %v1578_v58, %v1577_v33  ;;  %v1586_v35 = vadd.f32 %v1585_v22, %v1584_v41 }
 0x3a4   : > { %v1591_v60 = vadd.f32 %v1542_v25, %v1541_v38  ;;  %2458 = vrsqrt.f32 %v1498_v39  ;;  %v1561_v62 = vrot.slane %v1560_v13, 1 }
 0x3a5   : > { %v2449_v9 = vpop.eup %2448  ;;  %v1566_v17 = vrot.slane %v1565_v18, 2  ;;  %v1573_v11 = vrot.slane %v1572_v45, 2  ;;  %v1580_v59 = vrot.slane %v1579_v42, 2  ;;  %v1587_v54 = vrot.slane %v1586_v35, 2 }
 0x3a6   : > { %v1466_v30 = vmul.f32 %v2449_v9, %v3624_v50  ;;  %v1562_v43 = vadd.f32 %v1561_v62, %v1560_v13  ;;  %v1592_v48 = vrot.slane %v1591_v60, 4 }
 0x3a7   : > { %v1567_v34 = vadd.f32 %v1566_v17, %v1565_v18  ;;  %v1574_v46 = vadd.f32 %v1573_v11, %v1572_v45  ;;  %v1581_v21 = vadd.f32 %v1580_v59, %v1579_v42  ;;  %v1588_v6 = vadd.f32 %v1587_v54, %v1586_v35 }
 0x3a8   : > { %v2451_v29 = vpop.eup %2450  ;;  %v1483_v12 = vmul.f32 %v1466_v30, %v3567_v28  ;;  %v1484_v33 = vmul.f32 %v1466_v30, %v3565_v52  ;;  %v3654_v16 = vadd.f32 %v1562_v43, %v3413_v0  ;;  %v1593_v7 = vadd.f32 %v1592_v48, %v1591_v60 }
 0x3a9   : > { %v2453_v5 = vpop.eup %2452  ;;  %v1467_v41 = vmul.f32 %v2451_v29, %v1431_v20  ;;  %v1568_v1 = vrot.slane %v1567_v34, 1  ;;  %v1575_v39 = vrot.slane %v1574_v46, 1  ;;  %v1582_v50 = vrot.slane %v1581_v21, 1 }
 0x3aa   : > { %v1523_v32 = vmul.f32 %v2453_v5, %v1483_v12  ;;  %v1524_v56 = vmul.f32 %v2453_v5, %v1484_v33  ;;  %1631 = vmax.xlane.f32.xlu0 %v3654_v16  ;;  %v1589_v53 = vrot.slane %v1588_v6, 1  ;;  %v1594_v55 = vrot.slane %v1593_v7, 2 }
 0x3ab   : > { %v2455_v14 = vpop.eup %2454  ;;  %v1485_v28 = vmul.f32 %v1467_v41, %v3581_v4  ;;  %v1486_v52 = vmul.f32 %v1467_v41, %v3579_v47  ;;  %v1569_v58 = vadd.f32 %v1568_v1, %v1567_v34  ;;  %v1576_v0 = vadd.f32 %v1575_v39, %v1574_v46  ;;  %v4052_v41 = vld [vmem:[#allocation24_spill] sm:$0xff] }
 0x3ac   : > { %v2457_v22 = vpop.eup %2456  ;;  %v1543_v38 = vmul.f32 %v1523_v32, %v3232_v24  ;;  %v1544_v20 = vmul.f32 %v1524_v56, %v3230_v31  ;;  %v1468_v25 = vmul.f32 %v2455_v14, %v3636_v63  ;;  %v1583_v13 = vadd.f32 %v1582_v50, %v1581_v21 }
 0x3ad   : > { %v1525_v18 = vmul.f32 %v2457_v22, %v1485_v28  ;;  %v1526_v45 = vmul.f32 %v2457_v22, %v1486_v52  ;;  %v3663_v42 = vadd.f32 %v1569_v58, %v3419_v19  ;;  %v3666_v35 = vadd.f32 %v1576_v0, %v3422_v51  ;;  %v4053_v52 = vld [vmem:[#allocation26_spill] sm:$0xff] }
 0x3ae   : > { %v2459_v4 = vpop.eup %2458  ;;  %v1598_v47 = vadd.f32 %v1544_v20, %v1543_v38  ;;  %v1487_v60 = vmul.f32 %v1468_v25, %v3598_v10  ;;  %v1488_v62 = vmul.f32 %v1468_v25, %v3596_v36  ;;  %v3671_v9 = vadd.f32 %v1583_v13, %v3424_v49  ;;  %v4049_v10 = vld [vmem:[#allocation23_spill] sm:$0xff]  ;;  %v4050_v36 = vld [vmem:[#allocation21_spill] sm:$0xff]  ;;  %v4054_v20 = vld [vmem:[#allocation22_spill] sm:$0xff] }
 0x3af   : > { %v1545_v63 = vmul.f32 %v1525_v18, %v3243_v23  ;;  %v1546_v17 = vmul.f32 %v1526_v45, %v3241_v37  ;;  %1633 = vmax.xlane.f32.xlu1 %v3663_v42  ;;  %1635 = vmax.xlane.f32.xlu0 %v3666_v35  ;;  %v1590_v19 = vadd.f32 %v1589_v53, %v1588_v6  ;;  %v4051_v49 = vld [vmem:[#allocation13_spill] sm:$0xff]  ;;  %v4055_v18 = vld [vmem:[#allocation14_spill] sm:$0xff] }
 0x3b0   : > { %v1527_v51 = vmul.f32 %v2459_v4, %v1487_v60  ;;  %v1528_v11 = vmul.f32 %v2459_v4, %v1488_v62  ;;  %v1595_v59 = vadd.f32 %v1594_v55, %v1593_v7  ;;  %v1599_v54 = vrot.slane %v1598_v47, 4 }
 0x3b1   : > { %v1605_v30 = vadd.f32 %v1546_v17, %v1545_v63  ;;  %v1624_v43 = vadd.f32 %v1590_v19, %v4049_v10 }
 0x3b2   : > { %v1547_v48 = vmul.f32 %v1527_v51, %v4050_v36  ;;  %v1548_v34 = vmul.f32 %v1528_v11, %v4051_v49  ;;  %v1596_v46 = vrot.slane %v1595_v59, 1  ;;  %v1600_v21 = vadd.f32 %v1599_v54, %v1598_v47 }
 0x3b3   : > { %1637 = vmax.xlane.f32.xlu1 %v3671_v9  ;;  %1639 = vmax.xlane.f32.xlu0 %v1624_v43  ;;  %v1606_v29 = vrot.slane %v1605_v30, 4 }
 0x3b4   : > { %v1612_v12 = vadd.f32 %v1548_v34, %v1547_v48  ;;  %v1597_v33 = vadd.f32 %v1596_v46, %v1595_v59  ;;  %v1601_v6 = vrot.slane %v1600_v21, 2 }
 0x3b5   : > { %v1607_v5 = vadd.f32 %v1606_v29, %v1605_v30 }
 0x3b6   : > { %v1625_v7 = vadd.f32 %v1597_v33, %v4052_v41  ;;  %v1602_v1 = vadd.f32 %v1601_v6, %v1600_v21  ;;  %v1613_v39 = vrot.slane %v1612_v12, 4 }
 0x3b7   : > { %v1608_v50 = vrot.slane %v1607_v5, 2 }
 0x3b8   : > { %1641 = vmax.xlane.f32.xlu1 %v1625_v7  ;;  %v1603_v32 = vrot.slane %v1602_v1, 1  ;;  %v1614_v56 = vadd.f32 %v1613_v39, %v1612_v12 }
 0x3b9   : > { %v1609_v53 = vadd.f32 %v1608_v50, %v1607_v5 }
 0x3ba   : > { %v1604_v55 = vadd.f32 %v1603_v32, %v1602_v1  ;;  %v1615_v14 = vrot.slane %v1614_v56, 2 }
 0x3bb   : > { %v1610_v28 = vrot.slane %v1609_v53, 1 }
 0x3bc   : > { %v1626_v58 = vadd.f32 %v1604_v55, %v4053_v52  ;;  %v1616_v0 = vadd.f32 %v1615_v14, %v1614_v56 }
 0x3bd   : > { %v1611_v22 = vadd.f32 %v1610_v28, %v1609_v53 }
 0x3be   : > { %1643 = vmax.xlane.f32.xlu0 %v1626_v58  ;;  %v1617_v38 = vrot.slane %v1616_v0, 1 }
 0x3bf   : > { %v1627_v25 = vadd.f32 %v1611_v22, %v4054_v20 }
 0x3c0   : > { %v1618_v13 = vadd.f32 %v1617_v38, %v1616_v0 }
 0x3c1   : > { %1645 = vmax.xlane.f32.xlu1 %v1627_v25 }
 0x3c2   : > { %v1628_v45 = vadd.f32 %v1618_v13, %v4055_v18 }
 0x3c4   : > { %1647 = vmax.xlane.f32.xlu0 %v1628_v45 }
 0x42d   : > { %v1630_v4 = vpop.xlane.xlu1 %1629 }
 0x42e   : > { %v1649_v47 = vsub.f32 %v3641_v61, %v1630_v4 }
 0x430   : > { %v1659_v60 = vmul.f32 1.442695, %v1649_v47 }
 0x432   : > { %2460 = vpow2.f32 %v1659_v60 }
 0x437   : > { %v1632_v62 = vpop.xlane.xlu0 %1631 }
 0x438   : > { %v1650_v63 = vsub.f32 %v3654_v16, %v1632_v62 }
 0x43a   : > { %v1661_v17 = vmul.f32 1.442695, %v1650_v63  ;;  %v4057_v63 = vld [vmem:[#allocation20_spill] sm:$0xff] }
 0x43c   : > { %v2461_v19 = vpop.eup %2460  ;;  %2462 = vpow2.f32 %v1661_v17  ;;  %v1634_v51 = vpop.xlane.xlu1 %1633 }
 0x43d   : > { %v1636_v11 = vpop.xlane.xlu0 %1635  ;;  %v1651_v59 = vsub.f32 %v3663_v42, %v1634_v51  ;;  %1679 = vadd.xlane.f32.xlu1 %v2461_v19  ;;  %v4058_v51 = vld [vmem:[#allocation12_spill] sm:$0xff] }
 0x43e   : > { %v1652_v54 = vsub.f32 %v3666_v35, %v1636_v11 }
 0x43f   : > { %v1663_v30 = vmul.f32 1.442695, %v1651_v59 }
 0x440   : > { %v1665_v10 = vmul.f32 1.442695, %v1652_v54  ;;  %v1638_v48 = vpop.xlane.xlu1 %1637 }
 0x441   : > { %v1640_v34 = vpop.xlane.xlu0 %1639  ;;  %2464 = vpow2.f32 %v1663_v30  ;;  %v1653_v61 = vsub.f32 %v3671_v9, %v1638_v48 }
 0x442   : > { %v1654_v46 = vsub.f32 %v1624_v43, %v1640_v34  ;;  %2466 = vpow2.f32 %v1665_v10  ;;  %v4059_v10 = vld [vmem:[#allocation18_spill] sm:$0xff]  ;;  %v4060_v34 = vld [vmem:[#allocation19_spill] sm:$0xff] }
 0x443   : > { %v1667_v16 = vmul.f32 1.442695, %v1653_v61 }
 0x444   : > { %v1669_v21 = vmul.f32 1.442695, %v1654_v46 }
 0x445   : > { %2468 = vpow2.f32 %v1667_v16  ;;  %v1642_v29 = vpop.xlane.xlu1 %1641 }
 0x446   : > { %v2463_v12 = vpop.eup %2462  ;;  %2470 = vpow2.f32 %v1669_v21  ;;  %v1655_v33 = vsub.f32 %v1625_v7, %v1642_v29 }
 0x447   : > { %1681 = vadd.xlane.f32.xlu0 %v2463_v12 }
 0x448   : > { %v1671_v42 = vmul.f32 1.442695, %v1655_v33 }
 0x44a   : > { %2472 = vpow2.f32 %v1671_v42 }
 0x44b   : > { %v2465_v35 = vpop.eup %2464  ;;  %v1644_v6 = vpop.xlane.xlu0 %1643 }
 0x44c   : > { %v2467_v5 = vpop.eup %2466  ;;  %1683 = vadd.xlane.f32.xlu1 %v2465_v35  ;;  %v1656_v41 = vsub.f32 %v1626_v58, %v1644_v6 }
 0x44d   : > { %1685 = vadd.xlane.f32.xlu0 %v2467_v5 }
 0x44e   : > { %v1673_v1 = vmul.f32 1.442695, %v1656_v41  ;;  %v1646_v9 = vpop.xlane.xlu1 %1645 }
 0x44f   : > { %v2469_v43 = vpop.eup %2468  ;;  %v1657_v39 = vsub.f32 %v1627_v25, %v1646_v9  ;;  %v4056_v25 = vld [vmem:[#allocation17_spill] sm:$0xff] }
 0x450   : > { %v3690_v50 = vpop.eup %2470  ;;  %2474 = vpow2.f32 %v1673_v1  ;;  %1687 = vadd.xlane.f32.xlu1 %v2469_v43 }
 0x451   : > { %v1675_v32 = vmul.f32 1.442695, %v1657_v39  ;;  %1689 = vadd.xlane.f32.xlu0 %v3690_v50  ;;  %v1648_v7 = vpop.xlane.xlu0 %1647 }
 0x452   : > { %v1658_v56 = vsub.f32 %v1628_v45, %v1648_v7 }
 0x453   : > { %2476 = vpow2.f32 %v1675_v32 }
 0x454   : > { %v3693_v53 = vpop.eup %2472  ;;  %v1677_v55 = vmul.f32 1.442695, %v1658_v56 }
 0x455   : > { %1691 = vadd.xlane.f32.xlu1 %v3693_v53 }
 0x456   : > { %2478 = vpow2.f32 %v1677_v55 }
 0x45a   : > { %v3696_v14 = vpop.eup %2474 }
 0x45b   : > { %1693 = vadd.xlane.f32.xlu0 %v3696_v14 }
 0x45d   : > { %v3699_v28 = vpop.eup %2476 }
 0x45e   : > { %1695 = vadd.xlane.f32.xlu1 %v3699_v28 }
 0x460   : > { %v3702_v52 = vpop.eup %2478 }
 0x461   : > { %1697 = vadd.xlane.f32.xlu0 %v3702_v52 }
 0x4ca   : > { %v1680_v58 = vpop.xlane.xlu1 %1679 }
 0x4cb   : > { %2480 = vrcp.f32 %v1680_v58 }
 0x4d4   : > { %v1682_v0 = vpop.xlane.xlu0 %1681 }
 0x4d5   : > { %v2481_v22 = vpop.eup %2480  ;;  %2482 = vrcp.f32 %v1682_v0 }
 0x4d6   : > { %v1709_v38 = vmul.f32 %v2481_v22, %v2461_v19 }
 0x4d8   : > { %v1720_v20 = vmul.f32 %v1709_v38, %v4043_v15  ;;  %v1719_v13 = vmul.f32 %v1709_v38, %v4056_v25 }
 0x4d9   : > { %v1684_v18 = vpop.xlane.xlu1 %1683 }
 0x4da   : > { %2484 = vrcp.f32 %v1684_v18  ;;  %v1686_v45 = vpop.xlane.xlu0 %1685  ;;  %1741 = vadd.xlane.f32.xlu0 %v1720_v20  ;;  %1739 = vadd.xlane.f32.xlu1 %v1719_v13 }
 0x4db   : > { %2486 = vrcp.f32 %v1686_v45 }
 0x4dd   : > { %v1688_v4 = vpop.xlane.xlu1 %1687 }
 0x4de   : > { %2488 = vrcp.f32 %v1688_v4  ;;  %v1690_v47 = vpop.xlane.xlu0 %1689 }
 0x4df   : > { %v2483_v60 = vpop.eup %2482  ;;  %2490 = vrcp.f32 %v1690_v47 }
 0x4e0   : > { %v1710_v62 = vmul.f32 %v2483_v60, %v2463_v12 }
 0x4e2   : > { %v1722_v17 = vmul.f32 %v1710_v62, %v4057_v63  ;;  %v1721_v19 = vmul.f32 %v1710_v62, %v4058_v51  ;;  %v1692_v11 = vpop.xlane.xlu1 %1691 }
 0x4e3   : > { %2492 = vrcp.f32 %v1692_v11 }
 0x4e4   : > { %v2485_v15 = vpop.eup %2484  ;;  %1745 = vadd.xlane.f32.xlu0 %v1722_v17  ;;  %1743 = vadd.xlane.f32.xlu1 %v1721_v19 }
 0x4e5   : > { %v2487_v59 = vpop.eup %2486  ;;  %v1711_v54 = vmul.f32 %v2485_v15, %v2465_v35 }
 0x4e6   : > { %v1712_v30 = vmul.f32 %v2487_v59, %v2467_v5 }
 0x4e7   : > { %v1724_v48 = vmul.f32 %v1711_v54, %v4059_v10  ;;  %v1723_v61 = vmul.f32 %v1711_v54, %v4060_v34 }
 0x4e8   : > { %v2489_v46 = vpop.eup %2488  ;;  %v1694_v16 = vpop.xlane.xlu0 %1693  ;;  %v1726_v21 = vmul.f32 %v1712_v30, %v3054_v57  ;;  %v1725_v29 = vmul.f32 %v1712_v30, %v3067_v3 }
 0x4e9   : > { %1749 = vadd.xlane.f32.xlu0 %v1724_v48  ;;  %1747 = vadd.xlane.f32.xlu1 %v1723_v61  ;;  %2494 = vrcp.f32 %v1694_v16  ;;  %v1713_v12 = vmul.f32 %v2489_v46, %v2469_v43  ;;  %v2491_v33 = vpop.eup %2490  ;;  %v4061_v61 = vlaneseq }
 0x4ea   : > { %v1714_v5 = vmul.f32 %v2491_v33, %v3690_v50 }
 0x4eb   : > { %v1696_v42 = vpop.xlane.xlu1 %1695  ;;  %v1728_v35 = vmul.f32 %v1713_v12, %v4033_v26  ;;  %v1727_v6 = vmul.f32 %v1713_v12, %v4034_v2  ;;  %v1980_v46 = vand.u32 127, %v4061_v61 }
 0x4ec   : > { %2496 = vrcp.f32 %v1696_v42  ;;  %v1730_v57 = vmul.f32 %v1714_v5, %v4039_v40  ;;  %v1729_v3 = vmul.f32 %v1714_v5, %v3151_v44 }
 0x4ed   : > { %1753 = vadd.xlane.f32.xlu0 %v1726_v21  ;;  %1751 = vadd.xlane.f32.xlu1 %v1725_v29  ;;  %v2493_v41 = vpop.eup %2492 }
 0x4ee   : > { %v1698_v1 = vpop.xlane.xlu0 %1697  ;;  %v1715_v9 = vmul.f32 %v2493_v41, %v3693_v53 }
 0x4ef   : > { %2498 = vrcp.f32 %v1698_v1 }
 0x4f0   : > { %v1732_v26 = vmul.f32 %v1715_v9, %v3212_v8  ;;  %v1731_v2 = vmul.f32 %v1715_v9, %v3215_v27 }
 0x4f1   : > { %1757 = vadd.xlane.f32.xlu0 %v1728_v35  ;;  %1755 = vadd.xlane.f32.xlu1 %v1727_v6 }
 0x4f3   : > { %v2495_v43 = vpop.eup %2494 }
 0x4f4   : > { %v1716_v39 = vmul.f32 %v2495_v43, %v3696_v14 }
 0x4f5   : > { %1761 = vadd.xlane.f32.xlu0 %v1730_v57  ;;  %1759 = vadd.xlane.f32.xlu1 %v1729_v3  ;;  %v1985_v57 = vadd.s32 4294967288, %v1980_v46 }
 0x4f6   : > { %v2497_v50 = vpop.eup %2496  ;;  %v1734_v32 = vmul.f32 %v1716_v39, %v3230_v31  ;;  %v1733_v40 = vmul.f32 %v1716_v39, %v3232_v24 }
 0x4f7   : > { %v1717_v44 = vmul.f32 %v2497_v50, %v3699_v28 }
 0x4f9   : > { %1765 = vadd.xlane.f32.xlu0 %v1732_v26  ;;  %1763 = vadd.xlane.f32.xlu1 %v1731_v2  ;;  %v2499_v7 = vpop.eup %2498  ;;  %v1736_v56 = vmul.f32 %v1717_v44, %v3241_v37  ;;  %v1735_v8 = vmul.f32 %v1717_v44, %v3243_v23 }
 0x4fa   : > { %v1718_v27 = vmul.f32 %v2499_v7, %v3702_v52 }
 0x4fc   : > { %v1738_v53 = vmul.f32 %v1718_v27, %v4051_v49  ;;  %v1737_v55 = vmul.f32 %v1718_v27, %v4050_v36  ;;  %v4062_v27 = vld [vmem:[#allocation11_spill] sm:$0xff] }
 0x4fd   : > { %1769 = vadd.xlane.f32.xlu0 %v1734_v32  ;;  %1767 = vadd.xlane.f32.xlu1 %v1733_v40 }
 0x501   : > { %1773 = vadd.xlane.f32.xlu0 %v1736_v56  ;;  %1771 = vadd.xlane.f32.xlu1 %v1735_v8 }
 0x505   : > { %1777 = vadd.xlane.f32.xlu0 %v1738_v53  ;;  %1775 = vadd.xlane.f32.xlu1 %v1737_v55  ;;  %v3786_v53 = vsub.s32 %v1980_v46, %v4062_v27  ;;  %v3789_v55 = vsub.s32 %v1985_v57, %v4062_v27 }
 0x567   : > { %v3730_v31 = vpop.xlane.xlu0 %1741  ;;  %v3732_v24 = vpop.xlane.xlu1 %1739 }
 0x568   : > { %v1780_v14 = vmul.f32 %v3730_v31, %v3730_v31  ;;  %v1779_v37 = vmul.f32 %v3732_v24, %v3732_v24 }
 0x56a   : > { %v1799_v23 = vadd.f32 %v1780_v14, %v1779_v37 }
 0x56c   : > { %v1800_v28 = vrot.slane %v1799_v23, 4 }
 0x56e   : > { %v1801_v52 = vadd.f32 %v1800_v28, %v1799_v23 }
 0x570   : > { %v1802_v58 = vrot.slane %v1801_v52, 2 }
 0x571   : > { %v3738_v0 = vpop.xlane.xlu0 %1745  ;;  %v3740_v49 = vpop.xlane.xlu1 %1743 }
 0x572   : > { %v1803_v36 = vadd.f32 %v1802_v58, %v1801_v52  ;;  %v1782_v22 = vmul.f32 %v3738_v0, %v3738_v0  ;;  %v1781_v38 = vmul.f32 %v3740_v49, %v3740_v49 }
 0x574   : > { %v1804_v20 = vrot.slane %v1803_v36, 1  ;;  %v1806_v25 = vadd.f32 %v1782_v22, %v1781_v38 }
 0x576   : > { %v1805_v13 = vadd.f32 %v1804_v20, %v1803_v36  ;;  %v1807_v18 = vrot.slane %v1806_v25, 4  ;;  %v3746_v45 = vpop.xlane.xlu0 %1749  ;;  %v3748_v4 = vpop.xlane.xlu1 %1747 }
 0x577   : > { %v1784_v47 = vmul.f32 %v3746_v45, %v3746_v45  ;;  %v1783_v60 = vmul.f32 %v3748_v4, %v3748_v4 }
 0x578   : > { %v1869_v62 = vadd.f32 1.0, %v1805_v13  ;;  %v1808_v63 = vadd.f32 %v1807_v18, %v1806_v25  ;;  %v1919_v51 = vmax.f32 %v1805_v13, 1e-30 }
 0x579   : > { %v1813_v17 = vadd.f32 %v1784_v47, %v1783_v60 }
 0x57a   : > { %2500 = vrcp.f32 %v1869_v62  ;;  %v1809_v19 = vrot.slane %v1808_v63, 2  ;;  %v3754_v11 = vpop.xlane.xlu0 %1753  ;;  %v3756_v15 = vpop.xlane.xlu1 %1751 }
 0x57b   : > { %v1814_v59 = vrot.slane %v1813_v17, 4  ;;  %v1786_v54 = vmul.f32 %v3754_v11, %v3754_v11  ;;  %v1785_v30 = vmul.f32 %v3756_v15, %v3756_v15  ;;  %2502 = vrsqrt.f32 %v1919_v51 }
 0x57c   : > { %v1810_v10 = vadd.f32 %v1809_v19, %v1808_v63 }
 0x57d   : > { %v1815_v48 = vadd.f32 %v1814_v59, %v1813_v17  ;;  %v1820_v34 = vadd.f32 %v1786_v54, %v1785_v30 }
 0x57e   : > { %v1811_v16 = vrot.slane %v1810_v10, 1  ;;  %v3763_v21 = vpop.xlane.xlu0 %1757  ;;  %v3765_v29 = vpop.xlane.xlu1 %1755 }
 0x57f   : > { %v1816_v12 = vrot.slane %v1815_v48, 2  ;;  %v1821_v33 = vrot.slane %v1820_v34, 4  ;;  %v1788_v42 = vmul.f32 %v3763_v21, %v3763_v21  ;;  %v1787_v35 = vmul.f32 %v3765_v29, %v3765_v29 }
 0x580   : > { %v3771_v6 = vadd.f32 %v1811_v16, %v1810_v10 }
 0x581   : > { %v1817_v5 = vadd.f32 %v1816_v12, %v1815_v48  ;;  %v1822_v41 = vadd.f32 %v1821_v33, %v1820_v34  ;;  %v1827_v1 = vadd.f32 %v1788_v42, %v1787_v35 }
 0x582   : > { %v1870_v3 = vadd.f32 1.0, %v3771_v6  ;;  %v1920_v9 = vmax.f32 %v3771_v6, 1e-30  ;;  %v3775_v43 = vpop.xlane.xlu0 %1761  ;;  %v3777_v26 = vpop.xlane.xlu1 %1759 }
 0x583   : > { %v1818_v2 = vrot.slane %v1817_v5, 1  ;;  %v1823_v39 = vrot.slane %v1822_v41, 2  ;;  %v1828_v50 = vrot.slane %v1827_v1, 4  ;;  %v1790_v32 = vmul.f32 %v3775_v43, %v3775_v43 }
 0x584   : > { %v2501_v40 = vpop.eup %2500  ;;  %2504 = vrcp.f32 %v1870_v3  ;;  %v1789_v44 = vmul.f32 %v3777_v26, %v3777_v26 }
 0x585   : > { %v1889_v7 = vmul.f32 %v2501_v40, %v1805_v13  ;;  %v3783_v56 = vadd.f32 %v1818_v2, %v1817_v5  ;;  %v1824_v8 = vadd.f32 %v1823_v39, %v1822_v41  ;;  %v1829_v14 = vadd.f32 %v1828_v50, %v1827_v1  ;;  %v2503_v22 = vpop.eup %2502 }
 0x586   : > { %v1834_v37 = vadd.f32 %v1790_v32, %v1789_v44  ;;  %v3791_v23 = vpop.xlane.xlu0 %1765  ;;  %v3793_v28 = vpop.xlane.xlu1 %1763  ;;  %2506 = vrsqrt.f32 %v1920_v9 }
 0x587   : > { %v1899_v52 = vmul.f32 %v1889_v7, %v3732_v24  ;;  %v1900_v58 = vmul.f32 %v1889_v7, %v3730_v31  ;;  %v1871_v36 = vadd.f32 1.0, %v3783_v56  ;;  %v1825_v38 = vrot.slane %v1824_v8, 1 }
 0x588   : > { %v1830_v20 = vrot.slane %v1829_v14, 2  ;;  %v1835_v25 = vrot.slane %v1834_v37, 4  ;;  %v1792_v13 = vmul.f32 %v3791_v23, %v3791_v23  ;;  %v1921_v47 = vmax.f32 %v3783_v56, 1e-30 }
 0x589   : > { %v1939_v18 = vmul.f32 %v2503_v22, %v1899_v52  ;;  %2508 = vrcp.f32 %v1871_v36  ;;  %v1791_v60 = vmul.f32 %v3793_v28, %v3793_v28  ;;  %v1940_v24 = vmul.f32 %v2503_v22, %v1900_v58 }
 0x58a   : > { %v3803_v62 = vadd.f32 %v1825_v38, %v1824_v8  ;;  %v1831_v31 = vadd.f32 %v1830_v20, %v1829_v14  ;;  %v1836_v63 = vadd.f32 %v1835_v25, %v1834_v37  ;;  %v3805_v17 = vpop.xlane.xlu0 %1769  ;;  %v3807_v51 = vpop.xlane.xlu1 %1767  ;;  %2510 = vrsqrt.f32 %v1921_v47 }
 0x58b   : > { %v1841_v19 = vadd.f32 %v1792_v13, %v1791_v60  ;;  %v1794_v59 = vmul.f32 %v3805_v17, %v3805_v17  ;;  %v1984_v34 = vrot.slane %v1939_v18, %v3786_v53  ;;  %v1793_v46 = vmul.f32 %v3807_v51, %v3807_v51 }
 0x58c   : > { %v1872_v54 = vadd.f32 1.0, %v3803_v62  ;;  %v1922_v30 = vmax.f32 %v3803_v62, 1e-30  ;;  %v1832_v10 = vrot.slane %v1831_v31, 1  ;;  %v1837_v48 = vrot.slane %v1836_v63, 2 }
 0x58d   : > { %v1842_v61 = vrot.slane %v1841_v19, 4  ;;  %v1989_v12 = vrot.slane %v1940_v24, %v3789_v55  ;;  %v1848_v1 = vadd.f32 %v1794_v59, %v1793_v46 }
 0x58e   : > { %v2505_v16 = vpop.eup %2504  ;;  %2512 = vrcp.f32 %v1872_v54  ;;  %v3817_v33 = vadd.f32 %v1832_v10, %v1831_v31  ;;  %v1838_v42 = vadd.f32 %v1837_v48, %v1836_v63  ;;  %v3819_v35 = vpop.xlane.xlu0 %1773 }
 0x58f   : > { %v1890_v5 = vmul.f32 %v2505_v16, %v3771_v6  ;;  %2514 = vrsqrt.f32 %v1922_v30  ;;  %v1843_v41 = vadd.f32 %v1842_v61, %v1841_v19  ;;  %v3822_v57 = vpop.xlane.xlu1 %1771  ;;  %v1796_v39 = vmul.f32 %v3819_v35, %v3819_v35 }
 0x590   : > { %v1873_v3 = vadd.f32 1.0, %v3817_v33  ;;  %v1923_v9 = vmax.f32 %v3817_v33, 1e-30  ;;  %v1839_v2 = vrot.slane %v1838_v42, 1  ;;  %v2507_v50 = vpop.eup %2506  ;;  %v1849_v6 = vrot.slane %v1848_v1, 4 }
 0x591   : > { %v1901_v32 = vmul.f32 %v1890_v5, %v3740_v49  ;;  %v1902_v40 = vmul.f32 %v1890_v5, %v3738_v0  ;;  %v1844_v44 = vrot.slane %v1843_v41, 2  ;;  %v1991_v7 = vsel %vm1990_vm0, %v1989_v12, %v1984_v34 }
 0x592   : > { %2516 = vrcp.f32 %v1873_v3  ;;  %v3832_v8 = vadd.f32 %v1839_v2, %v1838_v42  ;;  %v1795_v27 = vmul.f32 %v3822_v57, %v3822_v57  ;;  %v1850_v22 = vadd.f32 %v1849_v6, %v1848_v1  ;;  %v3846_v19 = vpop.xlane.xlu0 %1777 }
 0x593   : > { %v2509_v14 = vpop.eup %2508  ;;  %v1941_v37 = vmul.f32 %v2507_v50, %v1901_v32  ;;  %v1942_v52 = vmul.f32 %v2507_v50, %v1902_v40  ;;  %2518 = vrsqrt.f32 %v1923_v9  ;;  %v1845_v58 = vadd.f32 %v1844_v44, %v1843_v41  ;;  %v3858_v16 = vpop.xlane.xlu1 %1775 }
 0x594   : > { %v1891_v49 = vmul.f32 %v2509_v14, %v3783_v56  ;;  %v1874_v0 = vadd.f32 1.0, %v3832_v8  ;;  %v1924_v36 = vmax.f32 %v3832_v8, 1e-30  ;;  %v1855_v13 = vadd.f32 %v1796_v39, %v1795_v27  ;;  %v2511_v24 = vpop.eup %2510 }
 0x595   : > { %v1995_v38 = vrot.slane %v1941_v37, %v3786_v53  ;;  %v1999_v20 = vrot.slane %v1942_v52, %v3789_v55  ;;  %v1846_v25 = vrot.slane %v1845_v58, 1  ;;  %v1851_v60 = vrot.slane %v1850_v22, 2 }
 0x596   : > { %v1903_v18 = vmul.f32 %v1891_v49, %v3748_v4  ;;  %v1904_v47 = vmul.f32 %v1891_v49, %v3746_v45  ;;  %2520 = vrcp.f32 %v1874_v0  ;;  %v1856_v63 = vrot.slane %v1855_v13, 4 }
 0x597   : > { %v2000_v56 = vsel %vm1990_vm0, %v1999_v20, %v1995_v38  ;;  %2522 = vrsqrt.f32 %v1924_v36  ;;  %v3844_v31 = vadd.f32 %v1846_v25, %v1845_v58  ;;  %v1852_v4 = vadd.f32 %v1851_v60, %v1850_v22 }
 0x598   : > { %v2513_v59 = vpop.eup %2512  ;;  %v2074_v54 = vsel %vm2073_vm1, %v2000_v56, %v1991_v7  ;;  %v1943_v30 = vmul.f32 %v2511_v24, %v1903_v18  ;;  %v1944_v10 = vmul.f32 %v2511_v24, %v1904_v47  ;;  %v1857_v46 = vadd.f32 %v1856_v63, %v1855_v13 }
 0x599   : > { %v2515_v48 = vpop.eup %2514  ;;  %2085 = vst.msk [vmem:[%s3851_s29] sm:$0x3] %vm2084_vm2, %v2074_v54  ;;  %v1892_v45 = vmul.f32 %v2513_v59, %v3803_v62  ;;  %v1875_v34 = vadd.f32 1.0, %v3844_v31  ;;  %v1925_v61 = vmax.f32 %v3844_v31, 1e-30  ;;  %v1853_v5 = vrot.slane %v1852_v4, 1 }
 0x59a   : > { %v2004_v12 = vrot.slane %v1943_v30, %v3786_v53  ;;  %v2008_v42 = vrot.slane %v1944_v10, %v3789_v55  ;;  %v1798_v41 = vmul.f32 %v3846_v19, %v3846_v19  ;;  %v1858_v62 = vrot.slane %v1857_v46, 2 }
 0x59b   : > { %v1905_v1 = vmul.f32 %v1892_v45, %v3756_v15  ;;  %v1906_v3 = vmul.f32 %v1892_v45, %v3754_v11  ;;  %2524 = vrcp.f32 %v1875_v34  ;;  %v1854_v2 = vadd.f32 %v1853_v5, %v1852_v4 }
 0x59c   : > { %v2517_v9 = vpop.eup %2516  ;;  %v1797_v39 = vmul.f32 %v3858_v16, %v3858_v16  ;;  %v1859_v6 = vadd.f32 %v1858_v62, %v1857_v46  ;;  %v2009_v7 = vsel %vm1990_vm0, %v2008_v42, %v2004_v12  ;;  %2526 = vrsqrt.f32 %v1925_v61 }
 0x59d   : > { %v2519_v50 = vpop.eup %2518  ;;  %v1945_v32 = vmul.f32 %v2515_v48, %v1905_v1  ;;  %v1946_v40 = vmul.f32 %v2515_v48, %v1906_v3  ;;  %v1893_v44 = vmul.f32 %v2517_v9, %v3817_v33  ;;  %v1876_v27 = vadd.f32 1.0, %v1854_v2 }
 0x59e   : > { %v1862_v15 = vadd.f32 %v1798_v41, %v1797_v39  ;;  %v1926_v49 = vmax.f32 %v1854_v2, 1e-30  ;;  %v1860_v0 = vrot.slane %v1859_v6, 1 }
 0x59f   : > { %v2013_v11 = vrot.slane %v1945_v32, %v3786_v53  ;;  %v2017_v14 = vrot.slane %v1946_v40, %v3789_v55  ;;  %v1907_v37 = vmul.f32 %v1893_v44, %v3765_v29  ;;  %v1908_v52 = vmul.f32 %v1893_v44, %v3763_v21 }
 0x5a0   : > { %v2521_v58 = vpop.eup %2520  ;;  %2528 = vrcp.f32 %v1876_v27  ;;  %v1863_v33 = vrot.slane %v1862_v15, 4  ;;  %v1861_v18 = vadd.f32 %v1860_v0, %v1859_v6 }
 0x5a1   : > { %v2523_v36 = vpop.eup %2522  ;;  %v2018_v22 = vsel %vm1990_vm0, %v2017_v14, %v2013_v11  ;;  %v1947_v38 = vmul.f32 %v2519_v50, %v1907_v37  ;;  %v1948_v20 = vmul.f32 %v2519_v50, %v1908_v52  ;;  %v1894_v25 = vmul.f32 %v2521_v58, %v3832_v8 }
 0x5a2   : > { %v2075_v13 = vsel %vm2073_vm1, %v2018_v22, %v2009_v7  ;;  %v1864_v47 = vadd.f32 %v1863_v33, %v1862_v15  ;;  %2530 = vrsqrt.f32 %v1926_v49  ;;  %v1877_v60 = vadd.f32 1.0, %v1861_v18 }
 0x5a3   : > { %2086 = vst.msk [vmem:[%s3851_s29 + $0x2] sm:$0x3] %vm2084_vm2, %v2075_v13  ;;  %v1909_v21 = vmul.f32 %v1894_v25, %v3777_v26  ;;  %v1910_v29 = vmul.f32 %v1894_v25, %v3775_v43  ;;  %v2022_v63 = vrot.slane %v1947_v38, %v3786_v53  ;;  %v2026_v59 = vrot.slane %v1948_v20, %v3789_v55 }
 0x5a4   : > { %v1865_v24 = vrot.slane %v1864_v47, 2  ;;  %2532 = vrcp.f32 %v1877_v60  ;;  %v1927_v12 = vmax.f32 %v1861_v18, 1e-30 }
 0x5a5   : > { %v2525_v56 = vpop.eup %2524  ;;  %v1949_v54 = vmul.f32 %v2523_v36, %v1909_v21  ;;  %v1950_v8 = vmul.f32 %v2523_v36, %v1910_v29  ;;  %v2027_v61 = vsel %vm1990_vm0, %v2026_v59, %v2022_v63 }
 0x5a6   : > { %v1895_v30 = vmul.f32 %v2525_v56, %v3844_v31  ;;  %v1866_v10 = vadd.f32 %v1865_v24, %v1864_v47  ;;  %v2527_v43 = vpop.eup %2526  ;;  %2534 = vrsqrt.f32 %v1927_v12 }
 0x5a7   : > { %v2031_v4 = vrot.slane %v1949_v54, %v3786_v53  ;;  %v2035_v26 = vrot.slane %v1950_v8, %v3789_v55 }
 0x5a8   : > { %v1911_v48 = vmul.f32 %v1895_v30, %v3793_v28  ;;  %v1912_v45 = vmul.f32 %v1895_v30, %v3791_v23  ;;  %v1867_v34 = vrot.slane %v1866_v10, 1 }
 0x5a9   : > { %v2036_v46 = vsel %vm1990_vm0, %v2035_v26, %v2031_v4 }
 0x5aa   : > { %v2529_v42 = vpop.eup %2528  ;;  %v2076_v31 = vsel %vm2073_vm1, %v2036_v46, %v2027_v61  ;;  %v1868_v5 = vadd.f32 %v1867_v34, %v1866_v10  ;;  %v1951_v41 = vmul.f32 %v2527_v43, %v1911_v48  ;;  %v1952_v1 = vmul.f32 %v2527_v43, %v1912_v45 }
 0x5ab   : > { %2087 = vst.msk [vmem:[%s3851_s29 + $0x4] sm:$0x3] %vm2084_vm2, %v2076_v31  ;;  %v1896_v3 = vmul.f32 %v2529_v42, %v1854_v2 }
 0x5ac   : > { %v1878_v62 = vadd.f32 1.0, %v1868_v5  ;;  %v2531_v9 = vpop.eup %2530  ;;  %v1928_v39 = vmax.f32 %v1868_v5, 1e-30  ;;  %v2040_v50 = vrot.slane %v1951_v41, %v3786_v53  ;;  %v2044_v32 = vrot.slane %v1952_v1, %v3789_v55 }
 0x5ad   : > { %v1913_v28 = vmul.f32 %v1896_v3, %v3807_v51  ;;  %v1914_v23 = vmul.f32 %v1896_v3, %v3805_v17 }
 0x5ae   : > { %2536 = vrcp.f32 %v1878_v62  ;;  %v2533_v6 = vpop.eup %2532  ;;  %v2045_v17 = vsel %vm1990_vm0, %v2044_v32, %v2040_v50 }
 0x5af   : > { %v1953_v40 = vmul.f32 %v2531_v9, %v1913_v28  ;;  %v1954_v44 = vmul.f32 %v2531_v9, %v1914_v23  ;;  %v1897_v27 = vmul.f32 %v2533_v6, %v1861_v18  ;;  %2538 = vrsqrt.f32 %v1928_v39 }
 0x5b0   : > { %v2535_v37 = vpop.eup %2534 }
 0x5b1   : > { %v2049_v7 = vrot.slane %v1953_v40, %v3786_v53  ;;  %v2053_v2 = vrot.slane %v1954_v44, %v3789_v55  ;;  %v1915_v11 = vmul.f32 %v1897_v27, %v3822_v57  ;;  %v1916_v14 = vmul.f32 %v1897_v27, %v3819_v35 }
 0x5b3   : > { %v2054_v51 = vsel %vm1990_vm0, %v2053_v2, %v2049_v7  ;;  %v1955_v58 = vmul.f32 %v2535_v37, %v1915_v11  ;;  %v1956_v49 = vmul.f32 %v2535_v37, %v1916_v14 }
 0x5b4   : > { %v2077_v15 = vsel %vm2073_vm1, %v2054_v51, %v2045_v17 }
 0x5b5   : > { %2088 = vst.msk [vmem:[%s3851_s29 + $0x6] sm:$0x3] %vm2084_vm2, %v2077_v15  ;;  %v2058_v38 = vrot.slane %v1955_v58, %v3786_v53  ;;  %v2062_v57 = vrot.slane %v1956_v49, %v3789_v55 }
 0x5b8   : > { %v2537_v52 = vpop.eup %2536 }
 0x5b9   : > { %v1898_v0 = vmul.f32 %v2537_v52, %v1868_v5  ;;  %v2539_v22 = vpop.eup %2538 }
 0x5bb   : > { %v1917_v33 = vmul.f32 %v1898_v0, %v3858_v16  ;;  %v1918_v36 = vmul.f32 %v1898_v0, %v3846_v19  ;;  %v2063_v19 = vsel %vm1990_vm0, %v2062_v57, %v2058_v38 }
 0x5bd   : > { %v1957_v20 = vmul.f32 %v2539_v22, %v1917_v33  ;;  %v1958_v35 = vmul.f32 %v2539_v22, %v1918_v36 }
 0x5bf   : > { %v2067_v25 = vrot.slane %v1957_v20, %v3786_v53  ;;  %v2071_v13 = vrot.slane %v1958_v35, %v3789_v55 }
 0x5c1   : > { %v2072_v16 = vsel %vm1990_vm0, %v2071_v13, %v2067_v25 }
 0x5c2   : > { %v2078_v18 = vsel %vm2073_vm1, %v2072_v16, %v2063_v19 }
 0x5c3   : > { %2089 = vst.msk [vmem:[%s3851_s29 + $0x8] sm:$0x3] %vm2084_vm2, %v2078_v18 }
 0x5c4   : > { %2553 = shalt.err (!%p2550_p7)
}
 0x5c5   : > { %s2554_s8 = scalar_lea.hbm %s3917_s3, 160  ;;  %s2558_s17 = scalar_lea.hbm %s3970_s2, 320 }
 0x5c6   : > { %p2555_p8 = scmp.ne.s32.totalorder %s3917_s3, %s2554_s8  ;;  %p2559_p0 = scmp.lt.u32.totalorder %s3917_s3, %s3970_s2 }
 0x5c7   : > { %p2560_p1 = scmp.lt.u32.totalorder %s2558_s17, %s2554_s8  ;;  %p2562_p3 = scmp.lt.u32.totalorder %s2554_s8, %s3917_s3 }
 0x5c8   : > { %p2556_p12 = pnand %p2555_p8, %p2682_p9 }
 0x5c9   : > { %p2561_p2 = por %p2560_p1, %p2559_p0 }
 0x5ca   : > { %p2557_p13 = pneg %p2556_p12 }
 0x5cb   : > { %p2563_p4 = por %p2562_p3, %p2561_p2 }
 0x5cd   : > { %p2564_p5 = pnand %p2563_p4, %p2557_p13 }
 0x5cf   : > { %2567 = shalt.err (!%p2564_p5)
}
 0x5d0   : > { %s2617_s27 = smov 32   ;;  %s2618_s28 = smov 2  }
 0x5d1   : > { %2289 = dma.vmem_to_hbm [thread:$0]  (%p2682_p9), %s3919_s23, 160, %s3917_s3, %s2091_s13, %s2617_s27, %s2617_s27, %s2618_s28  }
 0x5d2 PF: > { %s2119_s29 = sand.u32 1, %s2594_s9   ;;  %p2292_p6 = pnand %p2179_p11, %p2686_p10 }
 0x5d3   : > { %s2120_s19 = scalar_lea.sflag [#allocation4], %s2119_s29 }
 0x5d4   : > { %2589 = dma.done.wait (!%p2292_p6), %s2120_s19, 160  }
 0x5d5   : > { %2591 = vsyncadd (!%p2292_p6), %s2120_s19, 4294967136  ;;  %p15_p7 = scmp.ge.s32.totalorder %s2659_s15, 4   ;;  %s4063_s9 = smov %s2598_s10 }
 0x5d6   : > { %s4064_s10 = smov %s2602_s11  ;;  %s4065_s11 = smov %s2671_s18 }
 0x5d7   : > { %s4066_s12 = smov %s2659_s15  ;;  %17 = sbr.rel (!%p15_p7) target bundleno = 5 (0x5), region = 92 }
 0x5de   :  { %2125 = vsyncpa [#allocation3], 1 }
 0x5df   :  { %2127 = vsyncpa [#allocation3 + $0x1], 1 }
 0x5e0   :  { %2128 = vsyncpa [#allocation4], 1 }
 0x5e1   :  { %2130 = vsyncpa [#allocation4 + $0x1], 1 }

</bundles_post_ra>
